<compile_context>
chip_gen: v7x
topology: tpu7x:2x2x1
jax: 0.10.0
libtpu: 0.0.40
codegen_flags: <defaults>
</compile_context>

<pallas_src>
import jax
import jax.numpy as jnp
from jax.experimental import pallas as pl
from jax.experimental.pallas import tpu as pltpu


def _last_bottleneck_kernel(
    x_ref,                 # (TH, W, Cin)   bf16  H-tile of the input image
    halo_ref,              # (2, W, Cin)    bf16  rows just above/below the tile
    w1d_ref,               # (Cin, 2*C4)    bf16  [conv1 | downsample] fused 1x1
    s1d_ref, b1d_ref,      # (1, 2*C4)      f32   folded BN (bn1 | bn_ds)
    w2_ref,                # (3, 3*C4, C4)  bf16  3x3 conv, dx packed into K
    s2_ref, b2_ref,        # (1, C4)        f32
    w3_ref,                # (C4, C4)       bf16
    s3_ref, b3_ref,        # (1, C4)        f32
    o_ref,                 # (TH, W, C4)    out dtype (bf16 by default)
):
    TH, W, Cin = x_ref.shape
    C4 = w3_ref.shape[0]
    h_idx = pl.program_id(1)
    n_h = pl.num_programs(1)

    # ---- conv1 (1x1) + downsample (1x1): one fused MXU matmul over the tile
    # plus its two halo rows (so conv2's dy windows need no extra matmul). ----
    hal = halo_ref[...]
    xa = jnp.concatenate([hal[0:1], x_ref[...], hal[1:2]], axis=0)  # (TH+2,W,Cin)
    fused = jnp.dot(xa.reshape((TH + 2) * W, Cin), w1d_ref[...],
                    preferred_element_type=jnp.float32)
    fused = fused * s1d_ref[...] + b1d_ref[...]                     # f32 BN affine

    # Downsample branch: interior rows only; keep bf16 until the residual add.
    ident = fused[W:(TH + 1) * W, C4:].astype(jnp.bfloat16)

    # conv1 + bn1 + relu; then zero the halo rows that fall outside the image
    # (SAME padding pads t1 with zeros, not with bn1(conv1(0))).
    t1 = jnp.maximum(fused[:, :C4], 0.0).reshape(TH + 2, W, C4)
    top_keep = (h_idx > 0).astype(jnp.float32)
    bot_keep = (h_idx < n_h - 1).astype(jnp.float32)
    t1 = jnp.concatenate(
        [t1[0:1] * top_keep, t1[1:TH + 1], t1[TH + 1:TH + 2] * bot_keep], axis=0)

    # ---- conv2 (3x3, pad=1) + bn2 + relu ----
    # W taps as shifted views with a zero border column (no padded scratch, no
    # store+reload of t1); the 3 dx taps are packed along channels so conv2 is
    # 3 wide matmuls with K = 3*C4.
    zc = jnp.zeros((TH + 2, 1, C4), jnp.float32)
    left = jnp.concatenate([zc, t1[:, :W - 1, :]], axis=1)    # t1[:, w-1, :]
    right = jnp.concatenate([t1[:, 1:, :], zc], axis=1)       # t1[:, w+1, :]
    cat = jnp.concatenate([left, t1, right], axis=-1).astype(jnp.bfloat16)

    acc = jnp.zeros((TH * W, C4), jnp.float32)
    for dy in range(3):                           # static unroll: 3 wide matmuls
        win = cat[dy:dy + TH].reshape(TH * W, 3 * C4)          # bf16 dy window
        acc = acc + jnp.dot(win, w2_ref[dy], preferred_element_type=jnp.float32)
    t2 = jnp.maximum(acc * s2_ref[...] + b2_ref[...], 0.0)

    # ---- conv3 (1x1) + bn3 ----
    t3 = jnp.dot(t2.astype(jnp.bfloat16), w3_ref[...],
                 preferred_element_type=jnp.float32)
    t3 = t3 * s3_ref[...] + b3_ref[...]

    # ---- residual add + relu ----
    out = jnp.maximum(t3 + ident.astype(jnp.float32), 0.0)
    o_ref[...] = out.reshape(TH, W, C4).astype(o_ref.dtype)


def _vmem_bytes_per_step(tile_h, W, Cin, C4, out_bytes):
    """Rough per-grid-step VMEM need: double-buffered blocks + live temps."""
    thp = tile_h + 2
    blocks = 2 * (tile_h * W * Cin * 2            # x tile, bf16, double-buffered
                  + 2 * W * Cin * 2               # halo rows
                  + tile_h * W * C4 * out_bytes)  # output tile
    weights = 2 * ((Cin * 2 * C4 + 9 * C4 * C4 + C4 * C4) * 2 + 12 * C4 * 4)
    temps = thp * W * (2 * Cin + 30 * C4) + tile_h * W * C4 * 24
    return blocks + weights + temps


def _tpu_vmem_capacity_bytes():
    try:
        return int(pltpu.get_tpu_info().vmem_capacity_bytes)
    except Exception:
        return 64 * 2**20          # conservative: v7x per-TensorCore VMEM


def _select_tile_h(H, W, Cin, C4, out_bytes, budget):
    divisors = [d for d in range(1, H + 1) if H % d == 0]
    for th in sorted(divisors, reverse=True):      # largest tile that fits
        if _vmem_bytes_per_step(th, W, Cin, C4, out_bytes) <= budget:
            return th
    return 1


def last_bottleneck_nhwc(x_nhwc, params, *, tile_h=None, out_dtype=jnp.bfloat16):
    """x_nhwc: (N, H, W, Cin).  Returns (N, H, W, Cin//4) in out_dtype."""
    N, H, W, Cin = x_nhwc.shape
    C4 = params["w1"].shape[1]
    out_bytes = jnp.dtype(out_dtype).itemsize

    # Fold conv1 + downsample into one wide matmul; pack 3x3 weights per dy row
    # (K = kx*Ci); cast matmul weights to bf16, keep BN affines in f32.
    w1d = jnp.concatenate([params["w1"], params["wd"]], axis=1).astype(jnp.bfloat16)
    s1d = jnp.concatenate([params["s1"], params["sd"]], axis=1).astype(jnp.float32)
    b1d = jnp.concatenate([params["b1"], params["bd"]], axis=1).astype(jnp.float32)
    w2p = params["w2"].reshape(3, 3 * C4, C4).astype(jnp.bfloat16)   # (ky, kx*Ci, Co)
    w3 = params["w3"].astype(jnp.bfloat16)
    s2, b2 = params["s2"].astype(jnp.float32), params["b2"].astype(jnp.float32)
    s3, b3 = params["s3"].astype(jnp.float32), params["b3"].astype(jnp.float32)

    x = x_nhwc.astype(jnp.bfloat16)               # bf16 HBM read for activations

    # --- generation-aware H-tile / VMEM sizing ---
    vmem_cap = _tpu_vmem_capacity_bytes()
    if tile_h is None:
        tile_h = _select_tile_h(H, W, Cin, C4, out_bytes, int(0.55 * vmem_cap))
    assert H % tile_h == 0, (H, tile_h)
    n_h = H // tile_h
    need = _vmem_bytes_per_step(tile_h, W, Cin, C4, out_bytes)
    vmem_limit = int(min(max(int(1.3 * need), 32 * 2**20), int(0.9 * vmem_cap)))

    # --- conv2 dy-halo rows: 1 row above / below each H tile, gathered into a
    # tiny side input so tile BlockSpecs never overlap.  Border tiles get zero
    # rows (and are re-zeroed post-conv1 in the kernel). ---
    zero_row = jnp.zeros((N, 1, W, Cin), x.dtype)
    if n_h > 1:
        top = jnp.concatenate([zero_row, x[:, tile_h - 1:H - tile_h:tile_h]], axis=1)
        bot = jnp.concatenate([x[:, tile_h:H:tile_h], zero_row], axis=1)
    else:
        top, bot = zero_row, zero_row
    halo = jnp.stack([top, bot], axis=2)          # (N, n_h, 2, W, Cin)

    def _full(arr):
        nd = arr.ndim
        return pl.BlockSpec(arr.shape, lambda n, h, _nd=nd: (0,) * _nd)

    flops = 2 * N * H * W * C4 * (2 * Cin + 9 * C4 + C4)
    bytes_accessed = (x.size * 2 + halo.size * 2
                      + (w1d.size + w2p.size + w3.size) * 2
                      + (s1d.size + b1d.size + s2.size + b2.size
                         + s3.size + b3.size) * 4
                      + N * H * W * C4 * out_bytes)

    return pl.pallas_call(
        _last_bottleneck_kernel,
        out_shape=jax.ShapeDtypeStruct((N, H, W, C4), out_dtype),
        grid_spec=pltpu.PrefetchScalarGridSpec(
            num_scalar_prefetch=0,
            grid=(N, n_h),
            in_specs=[
                pl.BlockSpec((None, tile_h, W, Cin), lambda n, h: (n, h, 0, 0)),
                pl.BlockSpec((None, None, 2, W, Cin), lambda n, h: (n, h, 0, 0, 0)),
                _full(w1d), _full(s1d), _full(b1d),
                _full(w2p), _full(s2), _full(b2),
                _full(w3), _full(s3), _full(b3),
            ],
            out_specs=pl.BlockSpec((None, tile_h, W, C4), lambda n, h: (n, h, 0, 0)),
        ),
        compiler_params=pltpu.CompilerParams(
            dimension_semantics=("parallel", "parallel"),
            vmem_limit_bytes=vmem_limit,
        ),
        cost_estimate=pl.CostEstimate(flops=int(flops), transcendentals=0,
                                      bytes_accessed=int(bytes_accessed)),
    )(x, halo, w1d, s1d, b1d, w2p, s2, b2, w3, s3, b3)


def last_bottleneck(x_nchw, params, *, tile_h=None, out_dtype=jnp.bfloat16):
    """PyTorch-native interface: (N, Cin, H, W) -> (N, Cin//4, H, W)."""
    # Callers already in NHWC should use last_bottleneck_nhwc directly and skip
    # both HBM transposes.
    x = jnp.transpose(x_nchw, (0, 2, 3, 1))
    out = last_bottleneck_nhwc(x, params, tile_h=tile_h, out_dtype=out_dtype)
    return jnp.transpose(out, (0, 3, 1, 2))


def make_params(key, inchannels):
    """Deterministic parameter init; BatchNorm folded (inference mode)."""
    C4 = inchannels // 4
    eps = 1e-5
    ks = list(jax.random.split(key, 24))

    def bn(kg, kb, km, kv, c):
        gamma = jax.random.uniform(kg, (c,), jnp.float32, 0.5, 1.5)
        beta = 0.1 * jax.random.normal(kb, (c,), jnp.float32)
        mean = 0.1 * jax.random.normal(km, (c,), jnp.float32)
        var = jax.random.uniform(kv, (c,), jnp.float32, 0.5, 1.5)
        scale = gamma / jnp.sqrt(var + eps)
        bias = beta - mean * scale
        return scale.reshape(1, c), bias.reshape(1, c)

    w1 = 0.1 * jax.random.normal(ks[0], (inchannels, C4), jnp.float32)
    w2 = 0.1 * jax.random.normal(ks[1], (3, 3, C4, C4), jnp.float32)   # HWIO
    w3 = 0.1 * jax.random.normal(ks[2], (C4, C4), jnp.float32)
    wd = 0.1 * jax.random.normal(ks[3], (inchannels, C4), jnp.float32)
    s1, b1 = bn(ks[4], ks[5], ks[6], ks[7], C4)
    s2, b2 = bn(ks[8], ks[9], ks[10], ks[11], C4)
    s3, b3 = bn(ks[12], ks[13], ks[14], ks[15], C4)
    sd, bd = bn(ks[16], ks[17], ks[18], ks[19], C4)
    return dict(w1=w1, s1=s1, b1=b1, w2=w2, s2=s2, b2=b2,
                w3=w3, s3=s3, b3=b3, wd=wd, sd=sd, bd=bd)


def reference_forward(x_nchw, p):
    """Plain-JAX f32 NHWC reference (inference-mode BN), for validation."""
    x = jnp.transpose(x_nchw, (0, 2, 3, 1))
    C4 = p["w1"].shape[1]

    def aff(t, s, b):
        return t * s.reshape(1, 1, 1, C4) + b.reshape(1, 1, 1, C4)

    t = jnp.einsum("nhwc,cd->nhwd", x, p["w1"])
    t = jnp.maximum(aff(t, p["s1"], p["b1"]), 0.0)
    t = jax.lax.conv_general_dilated(
        t, p["w2"], (1, 1), "SAME",
        dimension_numbers=("NHWC", "HWIO", "NHWC"))
    t = jnp.maximum(aff(t, p["s2"], p["b2"]), 0.0)
    t = jnp.einsum("nhwc,cd->nhwd", t, p["w3"])
    t = aff(t, p["s3"], p["b3"])
    ident = aff(jnp.einsum("nhwc,cd->nhwd", x, p["wd"]), p["sd"], p["bd"])
    out = jnp.maximum(t + ident, 0.0)
    return jnp.transpose(out, (0, 3, 1, 2))


if __name__ == "__main__":
    N, Cin, H, W = 2, 16, 16, 16      # inchannels=16 -> out channels = 4
    key = jax.random.PRNGKey(0)
    kx, kp = jax.random.split(key)
    x = jax.random.normal(kx, (N, Cin, H, W), jnp.float32)
    params = make_params(kp, Cin)

    ref = jax.block_until_ready(reference_forward(x, params))

    # tile_h=8 exercises the halo path (2 H-tiles / image); tile_h=None
    # exercises the auto, generation-aware tile selection (single tile here).
    for th in (8, None):
        out = jax.block_until_ready(last_bottleneck(x, params, tile_h=th))
        assert out.shape == (N, Cin // 4, H, W), out.shape
        outf = out.astype(jnp.float32)
        max_err = float(jnp.max(jnp.abs(outf - ref)))
        # bf16 matmul inputs / intermediates / output with f32 accumulation.
        assert jnp.allclose(outf, ref, atol=6e-2, rtol=6e-2), (th, max_err)
    print("KERNEL_OK")
</pallas_src>

<mosaic_0001>
module attributes {stable_mosaic.version = 11 : i64} {
  func.func @_last_bottleneck_kernel(%arg0: i32, %arg1: i32, %arg2: memref<1x8x16x16xbf16, #tpu.memory_space<vmem>>, %arg3: memref<1x1x2x16x16xbf16, #tpu.memory_space<vmem>>, %arg4: memref<16x8xbf16, #tpu.memory_space<vmem>>, %arg5: memref<1x8xf32, #tpu.memory_space<vmem>>, %arg6: memref<1x8xf32, #tpu.memory_space<vmem>>, %arg7: memref<3x12x4xbf16, #tpu.memory_space<vmem>>, %arg8: memref<1x4xf32, #tpu.memory_space<vmem>>, %arg9: memref<1x4xf32, #tpu.memory_space<vmem>>, %arg10: memref<4x4xbf16, #tpu.memory_space<vmem>>, %arg11: memref<1x4xf32, #tpu.memory_space<vmem>>, %arg12: memref<1x4xf32, #tpu.memory_space<vmem>>, %arg13: memref<1x8x16x4xbf16, #tpu.memory_space<vmem>>) attributes {dimension_semantics = [#tpu.dimension_semantics<parallel>, #tpu.dimension_semantics<parallel>], iteration_bounds = array<i64: 2, 2>, scalar_prefetch = 0 : i64, scratch_operands = 0 : i64, tpu.core_type = #tpu.core_type<tc>, window_params = [{transform_indices = @transform_0, window_bounds = array<i64: 1, 8, 16, 16>}, {transform_indices = @transform_1, window_bounds = array<i64: 1, 1, 2, 16, 16>}, {pipeline_mode = #tpu.pipeline_mode<synchronous>, transform_indices = @transform_2, window_bounds = array<i64: 16, 8>}, {pipeline_mode = #tpu.pipeline_mode<synchronous>, transform_indices = @transform_3, window_bounds = array<i64: 1, 8>}, {pipeline_mode = #tpu.pipeline_mode<synchronous>, transform_indices = @transform_4, window_bounds = array<i64: 1, 8>}, {pipeline_mode = #tpu.pipeline_mode<synchronous>, transform_indices = @transform_5, window_bounds = array<i64: 3, 12, 4>}, {pipeline_mode = #tpu.pipeline_mode<synchronous>, transform_indices = @transform_6, window_bounds = array<i64: 1, 4>}, {pipeline_mode = #tpu.pipeline_mode<synchronous>, transform_indices = @transform_7, window_bounds = array<i64: 1, 4>}, {pipeline_mode = #tpu.pipeline_mode<synchronous>, transform_indices = @transform_8, window_bounds = array<i64: 4, 4>}, {pipeline_mode = #tpu.pipeline_mode<synchronous>, transform_indices = @transform_9, window_bounds = array<i64: 1, 4>}, {pipeline_mode = #tpu.pipeline_mode<synchronous>, transform_indices = @transform_10, window_bounds = array<i64: 1, 4>}, {transform_indices = @transform_11, window_bounds = array<i64: 1, 8, 16, 4>}]} {
    %c0 = arith.constant 0 : index
    %c0_0 = arith.constant 0 : index
    %c0_1 = arith.constant 0 : index
    %c0_2 = arith.constant 0 : index
    %c0_3 = arith.constant 0 : index
    %0 = vector.load %arg3[%c0, %c0_0, %c0_1, %c0_2, %c0_3] : memref<1x1x2x16x16xbf16, #tpu.memory_space<vmem>>, vector<1x1x2x16x16xbf16>
    %1 = vector.shape_cast %0 : vector<1x1x2x16x16xbf16> to vector<2x16x16xbf16>
    %2 = vector.extract_strided_slice %1 {offsets = [0, 0, 0], sizes = [1, 16, 16], strides = [1, 1, 1]} : vector<2x16x16xbf16> to vector<1x16x16xbf16>
    %c0_4 = arith.constant 0 : index
    %c0_5 = arith.constant 0 : index
    %c0_6 = arith.constant 0 : index
    %c0_7 = arith.constant 0 : index
    %3 = vector.load %arg2[%c0_4, %c0_5, %c0_6, %c0_7] : memref<1x8x16x16xbf16, #tpu.memory_space<vmem>>, vector<1x8x16x16xbf16>
    %4 = vector.shape_cast %3 : vector<1x8x16x16xbf16> to vector<8x16x16xbf16>
    %5 = vector.extract_strided_slice %1 {offsets = [1, 0, 0], sizes = [1, 16, 16], strides = [1, 1, 1]} : vector<2x16x16xbf16> to vector<1x16x16xbf16>
    %6 = tpu.concatenate %2, %4, %5 in 0 : vector<1x16x16xbf16>, vector<8x16x16xbf16>, vector<1x16x16xbf16> -> vector<10x16x16xbf16>
    %7 = vector.shape_cast %6 : vector<10x16x16xbf16> to vector<160x16xbf16>
    %c0_8 = arith.constant 0 : index
    %c0_9 = arith.constant 0 : index
    %8 = vector.load %arg4[%c0_8, %c0_9] : memref<16x8xbf16, #tpu.memory_space<vmem>>, vector<16x8xbf16>
    %cst = arith.constant dense<0.000000e+00> : vector<160x8xf32>
    %9 = tpu.matmul %7, %8, %cst {dimension_numbers = #tpu.dot_dimension_numbers<[1], [0], [0], [1], [0, 0, 1, 1], [], []>} : vector<160x16xbf16>, vector<16x8xbf16>, vector<160x8xf32> -> vector<160x8xf32>
    %c0_10 = arith.constant 0 : index
    %c0_11 = arith.constant 0 : index
    %10 = vector.load %arg5[%c0_10, %c0_11] : memref<1x8xf32, #tpu.memory_space<vmem>>, vector<1x8xf32>
    %11 = vector.broadcast %10 : vector<1x8xf32> to vector<160x8xf32>
    %12 = arith.mulf %9, %11 : vector<160x8xf32>
    %c0_12 = arith.constant 0 : index
    %c0_13 = arith.constant 0 : index
    %13 = vector.load %arg6[%c0_12, %c0_13] : memref<1x8xf32, #tpu.memory_space<vmem>>, vector<1x8xf32>
    %14 = vector.broadcast %13 : vector<1x8xf32> to vector<160x8xf32>
    %15 = arith.addf %12, %14 : vector<160x8xf32>
    %16 = vector.extract_strided_slice %15 {offsets = [16, 4], sizes = [128, 4], strides = [1, 1]} : vector<160x8xf32> to vector<128x4xf32>
    %17 = arith.truncf %16 : vector<128x4xf32> to vector<128x4xbf16>
    %18 = vector.extract_strided_slice %15 {offsets = [0, 0], sizes = [160, 4], strides = [1, 1]} : vector<160x8xf32> to vector<160x4xf32>
    %cst_14 = arith.constant 0.000000e+00 : f32
    %19 = vector.broadcast %cst_14 : f32 to vector<160x4xf32>
    %20 = arith.maximumf %18, %19 : vector<160x4xf32>
    %21 = vector.shape_cast %20 : vector<160x4xf32> to vector<10x16x4xf32>
    %c0_i32 = arith.constant 0 : i32
    %22 = arith.cmpi sgt, %arg1, %c0_i32 : i32
    %23 = arith.extui %22 : i1 to i32
    %24 = arith.sitofp %23 : i32 to f32
    %c1_i32 = arith.constant 1 : i32
    %25 = arith.cmpi slt, %arg1, %c1_i32 : i32
    %26 = arith.extui %25 : i1 to i32
    %27 = arith.sitofp %26 : i32 to f32
    %28 = vector.extract_strided_slice %21 {offsets = [0, 0, 0], sizes = [1, 16, 4], strides = [1, 1, 1]} : vector<10x16x4xf32> to vector<1x16x4xf32>
    %29 = vector.broadcast %24 : f32 to vector<1x16x4xf32>
    %30 = arith.mulf %28, %29 : vector<1x16x4xf32>
    %31 = vector.extract_strided_slice %21 {offsets = [1, 0, 0], sizes = [8, 16, 4], strides = [1, 1, 1]} : vector<10x16x4xf32> to vector<8x16x4xf32>
    %32 = vector.extract_strided_slice %21 {offsets = [9, 0, 0], sizes = [1, 16, 4], strides = [1, 1, 1]} : vector<10x16x4xf32> to vector<1x16x4xf32>
    %33 = vector.broadcast %27 : f32 to vector<1x16x4xf32>
    %34 = arith.mulf %32, %33 : vector<1x16x4xf32>
    %35 = tpu.concatenate %30, %31, %34 in 0 : vector<1x16x4xf32>, vector<8x16x4xf32>, vector<1x16x4xf32> -> vector<10x16x4xf32>
    %cst_15 = arith.constant 0.000000e+00 : f32
    %36 = vector.broadcast %cst_15 : f32 to vector<10x1x4xf32>
    %37 = vector.extract_strided_slice %35 {offsets = [0, 0, 0], sizes = [10, 15, 4], strides = [1, 1, 1]} : vector<10x16x4xf32> to vector<10x15x4xf32>
    %38 = tpu.concatenate %36, %37 in 1 : vector<10x1x4xf32>, vector<10x15x4xf32> -> vector<10x16x4xf32>
    %39 = vector.extract_strided_slice %35 {offsets = [0, 1, 0], sizes = [10, 15, 4], strides = [1, 1, 1]} : vector<10x16x4xf32> to vector<10x15x4xf32>
    %40 = tpu.concatenate %39, %36 in 1 : vector<10x15x4xf32>, vector<10x1x4xf32> -> vector<10x16x4xf32>
    %41 = tpu.concatenate %38, %35, %40 in 2 : vector<10x16x4xf32>, vector<10x16x4xf32>, vector<10x16x4xf32> -> vector<10x16x12xf32>
    %42 = arith.truncf %41 : vector<10x16x12xf32> to vector<10x16x12xbf16>
    %cst_16 = arith.constant 0.000000e+00 : f32
    %43 = vector.broadcast %cst_16 : f32 to vector<128x4xf32>
    %44 = vector.extract_strided_slice %42 {offsets = [0, 0, 0], sizes = [8, 16, 12], strides = [1, 1, 1]} : vector<10x16x12xbf16> to vector<8x16x12xbf16>
    %45 = vector.shape_cast %44 : vector<8x16x12xbf16> to vector<128x12xbf16>
    %c0_17 = arith.constant 0 : index
    %c0_18 = arith.constant 0 : index
    %c0_19 = arith.constant 0 : index
    %46 = vector.load %arg7[%c0_17, %c0_18, %c0_19] : memref<3x12x4xbf16, #tpu.memory_space<vmem>>, vector<1x12x4xbf16>
    %47 = vector.shape_cast %46 : vector<1x12x4xbf16> to vector<12x4xbf16>
    %cst_20 = arith.constant dense<0.000000e+00> : vector<128x4xf32>
    %48 = tpu.matmul %45, %47, %cst_20 {dimension_numbers = #tpu.dot_dimension_numbers<[1], [0], [0], [1], [0, 0, 1, 1], [], []>} : vector<128x12xbf16>, vector<12x4xbf16>, vector<128x4xf32> -> vector<128x4xf32>
    %49 = arith.addf %43, %48 : vector<128x4xf32>
    %50 = vector.extract_strided_slice %42 {offsets = [1, 0, 0], sizes = [8, 16, 12], strides = [1, 1, 1]} : vector<10x16x12xbf16> to vector<8x16x12xbf16>
    %51 = vector.shape_cast %50 : vector<8x16x12xbf16> to vector<128x12xbf16>
    %c1 = arith.constant 1 : index
    %c0_21 = arith.constant 0 : index
    %c0_22 = arith.constant 0 : index
    %52 = vector.load %arg7[%c1, %c0_21, %c0_22] : memref<3x12x4xbf16, #tpu.memory_space<vmem>>, vector<1x12x4xbf16>
    %53 = vector.shape_cast %52 : vector<1x12x4xbf16> to vector<12x4xbf16>
    %cst_23 = arith.constant dense<0.000000e+00> : vector<128x4xf32>
    %54 = tpu.matmul %51, %53, %cst_23 {dimension_numbers = #tpu.dot_dimension_numbers<[1], [0], [0], [1], [0, 0, 1, 1], [], []>} : vector<128x12xbf16>, vector<12x4xbf16>, vector<128x4xf32> -> vector<128x4xf32>
    %55 = arith.addf %49, %54 : vector<128x4xf32>
    %56 = vector.extract_strided_slice %42 {offsets = [2, 0, 0], sizes = [8, 16, 12], strides = [1, 1, 1]} : vector<10x16x12xbf16> to vector<8x16x12xbf16>
    %57 = vector.shape_cast %56 : vector<8x16x12xbf16> to vector<128x12xbf16>
    %c2 = arith.constant 2 : index
    %c0_24 = arith.constant 0 : index
    %c0_25 = arith.constant 0 : index
    %58 = vector.load %arg7[%c2, %c0_24, %c0_25] : memref<3x12x4xbf16, #tpu.memory_space<vmem>>, vector<1x12x4xbf16>
    %59 = vector.shape_cast %58 : vector<1x12x4xbf16> to vector<12x4xbf16>
    %cst_26 = arith.constant dense<0.000000e+00> : vector<128x4xf32>
    %60 = tpu.matmul %57, %59, %cst_26 {dimension_numbers = #tpu.dot_dimension_numbers<[1], [0], [0], [1], [0, 0, 1, 1], [], []>} : vector<128x12xbf16>, vector<12x4xbf16>, vector<128x4xf32> -> vector<128x4xf32>
    %61 = arith.addf %55, %60 : vector<128x4xf32>
    %c0_27 = arith.constant 0 : index
    %c0_28 = arith.constant 0 : index
    %62 = vector.load %arg8[%c0_27, %c0_28] : memref<1x4xf32, #tpu.memory_space<vmem>>, vector<1x4xf32>
    %63 = vector.broadcast %62 : vector<1x4xf32> to vector<128x4xf32>
    %64 = arith.mulf %61, %63 : vector<128x4xf32>
    %c0_29 = arith.constant 0 : index
    %c0_30 = arith.constant 0 : index
    %65 = vector.load %arg9[%c0_29, %c0_30] : memref<1x4xf32, #tpu.memory_space<vmem>>, vector<1x4xf32>
    %66 = vector.broadcast %65 : vector<1x4xf32> to vector<128x4xf32>
    %67 = arith.addf %64, %66 : vector<128x4xf32>
    %cst_31 = arith.constant 0.000000e+00 : f32
    %68 = vector.broadcast %cst_31 : f32 to vector<128x4xf32>
    %69 = arith.maximumf %67, %68 : vector<128x4xf32>
    %70 = arith.truncf %69 : vector<128x4xf32> to vector<128x4xbf16>
    %c0_32 = arith.constant 0 : index
    %c0_33 = arith.constant 0 : index
    %71 = vector.load %arg10[%c0_32, %c0_33] : memref<4x4xbf16, #tpu.memory_space<vmem>>, vector<4x4xbf16>
    %cst_34 = arith.constant dense<0.000000e+00> : vector<128x4xf32>
    %72 = tpu.matmul %70, %71, %cst_34 {dimension_numbers = #tpu.dot_dimension_numbers<[1], [0], [0], [1], [0, 0, 1, 1], [], []>} : vector<128x4xbf16>, vector<4x4xbf16>, vector<128x4xf32> -> vector<128x4xf32>
    %c0_35 = arith.constant 0 : index
    %c0_36 = arith.constant 0 : index
    %73 = vector.load %arg11[%c0_35, %c0_36] : memref<1x4xf32, #tpu.memory_space<vmem>>, vector<1x4xf32>
    %74 = vector.broadcast %73 : vector<1x4xf32> to vector<128x4xf32>
    %75 = arith.mulf %72, %74 : vector<128x4xf32>
    %c0_37 = arith.constant 0 : index
    %c0_38 = arith.constant 0 : index
    %76 = vector.load %arg12[%c0_37, %c0_38] : memref<1x4xf32, #tpu.memory_space<vmem>>, vector<1x4xf32>
    %77 = vector.broadcast %76 : vector<1x4xf32> to vector<128x4xf32>
    %78 = arith.addf %75, %77 : vector<128x4xf32>
    %79 = arith.extf %17 : vector<128x4xbf16> to vector<128x4xf32>
    %80 = arith.addf %78, %79 : vector<128x4xf32>
    %cst_39 = arith.constant 0.000000e+00 : f32
    %81 = vector.broadcast %cst_39 : f32 to vector<128x4xf32>
    %82 = arith.maximumf %80, %81 : vector<128x4xf32>
    %83 = vector.shape_cast %82 : vector<128x4xf32> to vector<8x16x4xf32>
    %84 = arith.truncf %83 : vector<8x16x4xf32> to vector<8x16x4xbf16>
    %c0_40 = arith.constant 0 : index
    %c0_41 = arith.constant 0 : index
    %c0_42 = arith.constant 0 : index
    %c0_43 = arith.constant 0 : index
    %85 = vector.load %arg13[%c0_40, %c0_41, %c0_42, %c0_43] : memref<1x8x16x4xbf16, #tpu.memory_space<vmem>>, vector<1x8x16x4xbf16>
    %86 = vector.shape_cast %85 : vector<1x8x16x4xbf16> to vector<8x16x4xbf16>
    %87 = vector.shape_cast %84 : vector<8x16x4xbf16> to vector<1x8x16x4xbf16>
    tpu.vector_store %arg13[%c0_40, %c0_41, %c0_42, %c0_43], %87 {strides = array<i32>} : memref<1x8x16x4xbf16, #tpu.memory_space<vmem>>, vector<1x8x16x4xbf16>,
    return
  }
  func.func @transform_0(%arg0: i32, %arg1: i32) -> (i32, i32, i32, i32) {
    %c0_i32 = arith.constant 0 : i32
    %c0_i32_0 = arith.constant 0 : i32
    %c0_i32_1 = arith.constant 0 : i32
    return %arg0, %arg1, %c0_i32, %c0_i32_0 : i32, i32, i32, i32
  }
  func.func @transform_1(%arg0: i32, %arg1: i32) -> (i32, i32, i32, i32, i32) {
    %c0_i32 = arith.constant 0 : i32
    %c0_i32_0 = arith.constant 0 : i32
    %c0_i32_1 = arith.constant 0 : i32
    %c0_i32_2 = arith.constant 0 : i32
    return %arg0, %arg1, %c0_i32, %c0_i32_0, %c0_i32_1 : i32, i32, i32, i32, i32
  }
  func.func @transform_2(%arg0: i32, %arg1: i32) -> (i32, i32) {
    %c0_i32 = arith.constant 0 : i32
    %c0_i32_0 = arith.constant 0 : i32
    %c0_i32_1 = arith.constant 0 : i32
    return %c0_i32, %c0_i32_0 : i32, i32
  }
  func.func @transform_3(%arg0: i32, %arg1: i32) -> (i32, i32) {
    %c0_i32 = arith.constant 0 : i32
    %c0_i32_0 = arith.constant 0 : i32
    %c0_i32_1 = arith.constant 0 : i32
    return %c0_i32, %c0_i32_0 : i32, i32
  }
  func.func @transform_4(%arg0: i32, %arg1: i32) -> (i32, i32) {
    %c0_i32 = arith.constant 0 : i32
    %c0_i32_0 = arith.constant 0 : i32
    %c0_i32_1 = arith.constant 0 : i32
    return %c0_i32, %c0_i32_0 : i32, i32
  }
  func.func @transform_5(%arg0: i32, %arg1: i32) -> (i32, i32, i32) {
    %c0_i32 = arith.constant 0 : i32
    %c0_i32_0 = arith.constant 0 : i32
    %c0_i32_1 = arith.constant 0 : i32
    %c0_i32_2 = arith.constant 0 : i32
    return %c0_i32, %c0_i32_0, %c0_i32_1 : i32, i32, i32
  }
  func.func @transform_6(%arg0: i32, %arg1: i32) -> (i32, i32) {
    %c0_i32 = arith.constant 0 : i32
    %c0_i32_0 = arith.constant 0 : i32
    %c0_i32_1 = arith.constant 0 : i32
    return %c0_i32, %c0_i32_0 : i32, i32
  }
  func.func @transform_7(%arg0: i32, %arg1: i32) -> (i32, i32) {
    %c0_i32 = arith.constant 0 : i32
    %c0_i32_0 = arith.constant 0 : i32
    %c0_i32_1 = arith.constant 0 : i32
    return %c0_i32, %c0_i32_0 : i32, i32
  }
  func.func @transform_8(%arg0: i32, %arg1: i32) -> (i32, i32) {
    %c0_i32 = arith.constant 0 : i32
    %c0_i32_0 = arith.constant 0 : i32
    %c0_i32_1 = arith.constant 0 : i32
    return %c0_i32, %c0_i32_0 : i32, i32
  }
  func.func @transform_9(%arg0: i32, %arg1: i32) -> (i32, i32) {
    %c0_i32 = arith.constant 0 : i32
    %c0_i32_0 = arith.constant 0 : i32
    %c0_i32_1 = arith.constant 0 : i32
    return %c0_i32, %c0_i32_0 : i32, i32
  }
  func.func @transform_10(%arg0: i32, %arg1: i32) -> (i32, i32) {
    %c0_i32 = arith.constant 0 : i32
    %c0_i32_0 = arith.constant 0 : i32
    %c0_i32_1 = arith.constant 0 : i32
    return %c0_i32, %c0_i32_0 : i32, i32
  }
  func.func @transform_11(%arg0: i32, %arg1: i32) -> (i32, i32, i32, i32) {
    %c0_i32 = arith.constant 0 : i32
    %c0_i32_0 = arith.constant 0 : i32
    %c0_i32_1 = arith.constant 0 : i32
    return %arg0, %arg1, %c0_i32, %c0_i32_0 : i32, i32, i32, i32
  }
}

</mosaic_0001>

<bundles_post_ra>
// kernel: tpu_custom_call.1
= control target key start
LH: loop header
LB: loop body
LE: loop exit
PB: predicated region body
PF: predicated region fallthrough
CT: control target
= control target key end

     0   :  { %s3640_s0 = inlined_call_operand.hbm [shape: bf16[2,16,16,16], index: 0, kind: input, shape index: {}]   ;;  %s3641_s1 = inlined_call_operand.hbm [shape: bf16[2,2,2,16,16], index: 1, kind: input, shape index: {}]   ;;  %s3642_s2 = inlined_call_operand.vmem [shape: bf16[16,8], index: 2, kind: input, shape index: {}]   ;;  %s3643_s3 = inlined_call_operand.vmem [shape: f32[1,8], index: 3, kind: input, shape index: {}]   ;;  %s3644_s4 = inlined_call_operand.vmem [shape: f32[1,8], index: 4, kind: input, shape index: {}]   ;;  %s3645_s5 = inlined_call_operand.vmem [shape: bf16[3,12,4], index: 5, kind: input, shape index: {}]   ;;  %s3646_s6 = inlined_call_operand.vmem [shape: f32[1,4], index: 6, kind: input, shape index: {}]   ;;  %s3647_s7 = inlined_call_operand.vmem [shape: f32[1,4], index: 7, kind: input, shape index: {}]   ;;  %s3648_s8 = inlined_call_operand.vmem [shape: bf16[4,4], index: 8, kind: input, shape index: {}]   ;;  %s3649_s9 = inlined_call_operand.vmem [shape: f32[1,4], index: 9, kind: input, shape index: {}]   ;;  %s3650_s10 = inlined_call_operand.vmem [shape: f32[1,4], index: 10, kind: input, shape index: {}]   ;;  %s3651_s11 = inlined_call_operand.vmem [shape: bf16[2,16,16,4], index: 11, kind: output, shape index: {}]  }
   0x1   :  { %3658 = sst [smem:[#allocation13_spill]] %s3640_s0 }
   0x2   :  { %3659 = sst [smem:[#allocation14_spill]] %s3647_s7 }
   0x3   :  { %3660 = sst [smem:[#allocation15_spill]] %s3649_s9 }
   0x4   :  { %3661 = sst [smem:[#allocation16_spill]] %s3650_s10 }
   0x5   :  { %3662 = sst [smem:[#allocation17_spill]] %s3651_s11 }
   0x6   :  { %16 = vsyncpa [#allocation3], 0 }
   0x7   :  { %18 = vsyncpa [#allocation3 + $0x1], 0 }
   0x8   :  { %19 = vsyncpa [#allocation5], 0 }
   0x9   :  { %21 = vsyncpa [#allocation5 + $0x1], 0  ;;  %s2800_s17 = smov 0   ;;  %s2802_s18 = smov 0  }
   0xa   :  { %s2804_s19 = smov 0   ;;  %s2806_s20 = smov 0  }
   0xb   :  { %s2808_s21 = smov 0   ;;  %s2810_s22 = smov 0  }
   0xc   :  { %s2812_s23 = smov 0   ;;  %s2814_s24 = smov 0  }
   0xd LB: > { %3663 = sst [smem:[#allocation8_spill]] %s2711_s19  ;;  %s2049_s25 = sadd.s32 4294967295, %s2731_s24   ;;  %s2731_s24 = sphi %s2814_s24, %s27_s24   ;;  %s2727_s23 = sphi %s2812_s23, %s3690_s23   ;;  %s2723_s22 = sphi %s2810_s22, %s3689_s22   ;;  %s2719_s21 = sphi %s2808_s21, %s3688_s21   ;;  %s2715_s20 = sphi %s2806_s20, %s3687_s20   ;;  %s2711_s19 = sphi %s2804_s19, %s3682_s19   ;;  %s2707_s18 = sphi %s2802_s18, %s3686_s18   ;;  %s2703_s17 = sphi %s2800_s17, %s3685_s17  }
   0xe   : > { %3664 = sst [smem:[#allocation9_spill]] %s2719_s21  ;;  %s36_s26 = sadd.s32 1, %s2723_s22 }
   0xf   : > { %p37_p0 = scmp.ge.s32.totalorder %s36_s26, 2  ;;  %s39_s27 = sadd.s32 1, %s2727_s23 }
  0x10   : > { %s48_s28 = sadd.s32 1, %s2711_s19  ;;  %p55_p1 = scmp.ne.s32.totalorder %s2711_s19, %s2707_s18 }
  0x11   : > { %s3692_s26 = smov (%p37_p0, %s36_s26), 0  ;;  %s3694_s27 = smov (!%p37_p0, %s39_s27), %s2727_s23 }
  0x12   : > { %3665 = sst [smem:[#allocation10_spill]] %s3692_s26  ;;  %s44_s29 = ssub.s32 %s2723_s22, %s3692_s26 }
  0x13   : > { %p56_p2 = scmp.eq.s32.totalorder %s2731_s24, 0  ;;  %p41_p3 = scmp.ge.s32.totalorder %s3694_s27, 2 }
  0x14   : > { %p61_p4 = scmp.ne.s32.totalorder %s2707_s18, %s2703_s17  ;;  %p62_p6 = scmp.eq.s32.totalorder %s2049_s25, 0 }
  0x15   : > { %p2851_p5 = por %p56_p2, %p55_p1  ;;  %s3696_s27 = smov (%p41_p3, %s3694_s27), 0 }
  0x16   : > { %3667 = sst [smem:[#allocation11_spill]] %s3696_s27  ;;  %p2857_p7 = por %p62_p6, %p61_p4 }
  0x17   : > { %s43_s13 = ssub.s32 %s2727_s23, %s3696_s27  ;;  %p2361_p8 = scmp.lt.s32.totalorder %s2731_s24, 4 }
  0x18   : > { %s3668_s12 = scalar_select %p2857_p7, 1, 0 }
  0x19   : > { %s45_s14 = sor.u32 %s44_s29, %s43_s13  ;;  %s2865_s15 = sand.u32 1, %s2711_s19  }
  0x1a   : > { %p46_p9 = scmp.eq.s32.totalorder %s45_s14, 0  ;;  %s2053_s16 = sshll.u32 %s2865_s15, 6 }
  0x1b   : > { %s2153_s17 = sshll.u32 %s2723_s22, 4  ;;  %s2056_s26 = sshll.u32 %s2727_s23, 5 }
  0x1c   : > { %s2870_s25 = scalar_select %p46_p9, %s2711_s19, %s48_s28  }
  0x1d   : > { %s368_s11 = sadd.s32 %s2153_s17, %s2056_s26  ;;  %s361_s10 = scalar_lea.vmem [#allocation2], %s2053_s16 }
  0x1e   : > { %3669 = sst [smem:[#allocation12_spill]] %s2870_s25  ;;  %s371_s9 = sshll.u32 %s361_s10, 4  ;;  %s2873_s9 = int_to_ptr.vmem [resolvable:$true] %s371_s9 }
  0x1f   : > { %s2057_s21 = sshll.u32 %s368_s11, 6  ;;  %s3670_s0 = sld [smem:[#allocation13_spill]] }
  0x20   : > { %p2884_p10 = pnand %p2361_p8, %p2851_p5  ;;  %s358_s10 = scalar_lea.sflag [#allocation3], %s2865_s15 }
  0x22   : > { %p2603_p13 = pneg %p2884_p10 }
  0x25   : > { %s2878_s29 = scalar_lea.hbm %s3670_s0, %s2057_s21  ;;  %s2606_s26 = scalar_lea.hbm %s3670_s0, 4096 }
  0x26   : > { %s2601_s11 = scalar_lea.hbm %s2878_s29, 1024  ;;  %p2607_p2 = scmp.lt.u32.totalorder %s2878_s29, %s3670_s0 }
  0x27   : > { %p2602_p12 = scmp.ne.s32.totalorder %s2878_s29, %s2601_s11  ;;  %p2608_p3 = scmp.lt.u32.totalorder %s2606_s26, %s2601_s11 }
  0x28   : > { %p2610_p5 = scmp.lt.u32.totalorder %s2601_s11, %s2878_s29 }
  0x29   : > { %p2604_p0 = pnand %p2603_p13, %p2602_p12  ;;  %p2609_p4 = por %p2608_p3, %p2607_p2 }
  0x2b   : > { %p2605_p1 = pneg %p2604_p0  ;;  %p2611_p6 = por %p2610_p5, %p2609_p4 }
  0x2d   : > { %p2612_p8 = pnand %p2611_p6, %p2605_p1 }
  0x2f   : > { %2615 = shalt.err (!%p2612_p8)
}
  0x30   : > { %s2616_s13 = scalar_lea.vmem %s2873_s9, 1024  ;;  %s2733_s14 = smov [#allocation2]  }
  0x31   : > { %p2617_p9 = scmp.ne.s32.totalorder %s2873_s9, %s2616_s13  ;;  %s2621_s16 = sshll.u32 %s2733_s14, 4  ;;  %s2622_s16 = int_to_ptr.vmem [resolvable:$false] %s2621_s16 }
  0x32   : > { %s2623_s17 = scalar_lea.vmem %s2622_s16, 2048  ;;  %p2624_p11 = scmp.lt.s32.totalorder %s2873_s9, %s2622_s16 }
  0x33   : > { %p2619_p12 = pnand %p2617_p9, %p2603_p13  ;;  %p2625_p2 = scmp.lt.s32.totalorder %s2623_s17, %s2616_s13 }
  0x35   : > { %p2620_p0 = pneg %p2619_p12  ;;  %p2626_p3 = por %p2625_p2, %p2624_p11 }
  0x37   : > { %p2627_p4 = pnand %p2626_p3, %p2620_p0 }
  0x39   : > { %2630 = shalt.err (!%p2627_p4)
}
  0x3a   : > { %s2734_s11 = smov 64   ;;  %s2735_s7 = smov 4  }
  0x3b   : > { %2357 = dma.hbm_to_vmem [thread:$0]  (!%p2884_p10), %s2878_s29, 1024, %s2873_s9, %s358_s10, %s2734_s11, %s2734_s11, %s2735_s7  }
  0x3c   : > { %p402_p11 = scmp.lt.s32.totalorder %s2731_s24, 5  ;;  %s2058_s21 = sshll.u32 %s2865_s15, 4 }
  0x3d   : > { %s2059_s26 = sshll.u32 %s2723_s22, 2  ;;  %p3672_p1 = scmp.ge.s32.totalorder %s2731_s24, 1 }
  0x3e   : > { %s2060_s30 = sshll.u32 %s2727_s23, 3  ;;  %s385_s13 = scalar_lea.vmem [#allocation4], %s2058_s21 }
  0x3f   : > { %p2925_p5 = pnand %p3672_p1, %p402_p11  ;;  %s394_s14 = sshll.u32 %s385_s13, 4  ;;  %s2930_s14 = int_to_ptr.vmem [resolvable:$true] %s394_s14 }
  0x40   : > { %s391_s16 = sadd.s32 %s2060_s30, %s2059_s26  ;;  %s382_s9 = scalar_lea.sflag [#allocation5], %s2865_s15 }
  0x41   : > { %s2061_s17 = sshll.u32 %s391_s16, 6  ;;  %s2636_s26 = scalar_lea.hbm %s3641_s1, 1024 }
  0x42   : > { %s2935_s19 = scalar_lea.hbm %s3641_s1, %s2061_s17 }
  0x43   : > { %s2631_s29 = scalar_lea.hbm %s2935_s19, 256  ;;  %p2637_p12 = scmp.lt.u32.totalorder %s2935_s19, %s3641_s1 }
  0x44   : > { %p2632_p6 = scmp.ne.s32.totalorder %s2935_s19, %s2631_s29  ;;  %p2638_p0 = scmp.lt.u32.totalorder %s2636_s26, %s2631_s29 }
  0x45   : > { %p2640_p3 = scmp.lt.u32.totalorder %s2631_s29, %s2935_s19 }
  0x46   : > { %p2634_p8 = pnand %p2632_p6, %p2603_p13  ;;  %p2639_p2 = por %p2638_p0, %p2637_p12 }
  0x48   : > { %p2635_p9 = pneg %p2634_p8  ;;  %p2641_p4 = por %p2640_p3, %p2639_p2 }
  0x4a   : > { %p2642_p11 = pnand %p2641_p4, %p2635_p9 }
  0x4c   : > { %2645 = shalt.err (!%p2642_p11)
}
  0x4d   : > { %s2646_s0 = scalar_lea.vmem %s2930_s14, 256  ;;  %s2736_s25 = smov [#allocation4]  }
  0x4e   : > { %p2647_p1 = scmp.ne.s32.totalorder %s2930_s14, %s2646_s0  ;;  %s2651_s16 = sshll.u32 %s2736_s25, 4  ;;  %s2652_s16 = int_to_ptr.vmem [resolvable:$false] %s2651_s16 }
  0x4f   : > { %s2653_s17 = scalar_lea.vmem %s2652_s16, 512  ;;  %p2654_p7 = scmp.lt.s32.totalorder %s2930_s14, %s2652_s16 }
  0x50   : > { %p2649_p6 = pnand %p2647_p1, %p2603_p13  ;;  %p2655_p12 = scmp.lt.s32.totalorder %s2653_s17, %s2646_s0 }
  0x52   : > { %p2650_p8 = pneg %p2649_p6  ;;  %p2656_p0 = por %p2655_p12, %p2654_p7 }
  0x54   : > { %p2657_p2 = pnand %p2656_p0, %p2650_p8 }
  0x56   : > { %2660 = shalt.err (!%p2657_p2)
}
  0x57   : > { %2360 = dma.hbm_to_vmem [thread:$0]  (!%p2884_p10), %s2935_s19, 256, %s2930_s14, %s382_s9, %s2734_s11, %s2734_s11, %s2735_s7  }
  0x58   : > { %406 = sbr.rel (%p2925_p5) target bundleno = 999 (0x3e7), region = 64  ;;  %s408_s29 = sand.u32 (!%p2925_p5), 1, %s2707_s18  }
  0x59   : > { %s2063_s10 = sshll.u32 (!%p2925_p5), %s408_s29, 6  ;;  %s409_s21 = scalar_lea.sflag (!%p2925_p5), [#allocation3], %s408_s29 }
  0x5a   : > { %s412_s26 = scalar_lea.vmem (!%p2925_p5), [#allocation2], %s2063_s10  ;;  %p3674_p7 = scmp.ne.s32.totalorder (!%p2925_p5), %s3668_s12, 0 }
  0x5f   : > { %2694 = dma.done.wait (%p3674_p7), %s409_s21, 1024  }
  0x60   : > { %2696 = vsyncadd (%p3674_p7), %s409_s21, 4294966272  ;;  %s2064_s28 = sshll.u32 %s408_s29, 4  ;;  %s418_s15 = scalar_lea.sflag [#allocation5], %s408_s29 }
  0x61   : > { %s421_s30 = scalar_lea.vmem [#allocation4], %s2064_s28 }
  0x62   : > { %2698 = dma.done.wait (%p3674_p7), %s418_s15, 256  }
  0x63   : > { %2700 = vsyncadd (%p3674_p7), %s418_s15, 4294967040  ;;  %v2571_v0 = vld [vmem:[%s3642_s2] sm:$0xff]   ;;  %vm561_vm0 = vcmask 130048   ;;  %v2574_v3 = vld [vmem:[%s412_s26 + $0x8] sm:$0xff]   ;;  %p787_p10 = scmp.gt.s32.totalorder %s2715_s20, 0  ;;  %vm880_vm1 = vcmask 1046528  }
  0x64   : > { %v2572_v1 = vld [vmem:[%s421_s30] sm:$0xff]   ;;  %2217 = vmatprep.subr.bf16.mxu0 %v2571_v0  ;;  %v2576_v5 = vld [vmem:[%s412_s26 + $0x18] sm:$0xff]   ;;  %v2578_v7 = vld [vmem:[%s412_s26 + $0x28] sm:$0xff]   ;;  %s2737_s0 = smov 4   ;;  %p790_p13 = scmp.lt.s32.totalorder %s2715_s20, 1  ;;  %vm819_vm2 = vcmask 1040384  }
  0x65   : > { %v2573_v2 = vld [vmem:[%s412_s26] sm:$0xff]   ;;  %2218 = vmatpush3.bf16.msra.mxu0 %v2571_v0  ;;  %2219 = vmatprep.mubr.msk.bf16.mxu0 %vm561_vm0, %v2572_v1  ;;  %v2575_v4 = vld [vmem:[%s412_s26 + $0x10] sm:$0xff]   ;;  %v2580_v9 = vld [vmem:[%s412_s26 + $0x38] sm:$0xff]   ;;  %s788_s27 = scalar_select %p787_p10, 1, 0  ;;  %vm1148_vm3 = vcmask 1045504  }
  0x66   : > { %v2577_v6 = vld [vmem:[%s412_s26 + $0x20] sm:$0xff]   ;;  %v2579_v8 = vld [vmem:[%s412_s26 + $0x30] sm:$0xff]   ;;  %v2581_v10 = vld [vmem:[%s421_s30 + $0x8] sm:$0xff]   ;;  %s2738_s25 = smov 8   ;;  %s2739_s28 = smov 124   ;;  %vm1061_vm4 = vcmask 31744  }
  0x67   : > { %v2994_v11 = vld [vmem:[%s3643_s3] ss:$0 sm:$0xff]  ;;  %s789_s13 = scvt.s32.f32 %s788_s27  ;;  %vm1082_vm5 = vcmask 64512   ;;  %vm1123_vm6 = vcmask 97280   ;;  %vm1579_vm7 = vcmask 1041408   ;;  %s3676_s9 = sld [smem:[#allocation14_spill]] }
  0x68   : > { %2220 = vmatmul.mubr.msk.bf16.vlgmr.msra.gmra.mrb[0].mxu0 %vm561_vm0, %v2573_v2  ;;  %v2999_v13 = vld [vmem:[%s3644_s4] ss:$0 sm:$0xff]  ;;  %s3115_s16 = scalar_select %p790_p13, 1, 0  ;;  %vm1902_vm8 = vcmask 27648  }
  0x69   : > { %2223 = vmatprep.mubr.msk.bf16.mxu0 %vm561_vm0, %v2574_v3  ;;  %v793_v27 = vstv %s789_s13  ;;  %s3677_s13 = sld [smem:[#allocation9_spill]]  ;;  %s3680_s11 = sld [smem:[#allocation17_spill]] }
  0x6a   : > { %s792_s17 = scvt.s32.f32 %s3115_s16 }
  0x6f   : > { %p472_p5 = scmp.lt.s32.totalorder %s3677_s13, 1 }
  0x70   : > { %2224 = vmatmul.mubr.msk.bf16.gmra.mrb[4].mxu0 %vm561_vm0, %v2575_v4 }
  0x71   : > { %2227 = vmatprep.mubr.msk.bf16.mxu0 %vm561_vm0, %v2576_v5  ;;  %s3698_s13 = smov (!%p472_p5, %s3677_s13), 1 }
  0x72   : > { %s2067_s10 = sshll.u32 %s3698_s13, 5 }
  0x78   : > { %2228 = vmatmul.mubr.msk.bf16.gmra.mrb[8].mxu0 %vm561_vm0, %v2577_v6 }
  0x79   : > { %2231 = vmatprep.mubr.msk.bf16.mxu0 %vm561_vm0, %v2578_v7 }
  0x80   : > { %2232 = vmatmul.mubr.msk.bf16.gmra.mrb[12].mxu0 %vm561_vm0, %v2579_v8 }
  0x81   : > { %2235 = vmatprep.mubr.msk.bf16.mxu0 %vm561_vm0, %v2580_v9 }
  0x88   : > { %2236 = vmatmul.mubr.msk.bf16.gmra.mrb[16].mxu0 %vm561_vm0, %v2581_v10 }
 0x13b   : > { %v2221_v12 = vpop.f32.mrb[0].mxu0 }
 0x13c   : > { %v714_v14 = vmul.f32 %v2221_v12, %v2994_v11  ;;  %v626_v15 = vpop.f32.mrb[1].mxu0 }
 0x13d   : > { %v712_v16 = vmul.f32 %v2994_v11, %v626_v15  ;;  %v2222_v17 = vpop.f32.mrb[2].mxu0 }
 0x13e   : > { %v3004_v18 = vadd.f32 %v2999_v13, %v714_v14  ;;  %v715_v19 = vmul.f32 %v2222_v17, %v2994_v11  ;;  %v629_v20 = vpop.f32.mrb[3].mxu0 }
 0x13f   : > { %v739_v21 = vadd.f32 %v2999_v13, %v712_v16  ;;  %v713_v22 = vmul.f32 %v2994_v11, %v629_v20 }
 0x140   : > { %v3010_v23 = vmax.f32 %v3004_v18, 0.0  ;;  %v3013_v24 = vadd.f32 %v2999_v13, %v715_v19 }
 0x141   : > { %v767_v25 = vmax.f32 %v739_v21, 0.0  ;;  %v740_v26 = vadd.f32 %v2999_v13, %v713_v22 }
 0x142   : > { %v3017_v28 = vmax.f32 %v3013_v24, 0.0  ;;  %v884_v31 = vrot.slane %v3010_v23, 1 }
 0x143   : > { %v768_v29 = vmax.f32 %v740_v26, 0.0  ;;  %v2225_v30 = vpop.f32.mrb[4].mxu0  ;;  %v3024_v36 = vmul.f32 %v793_v27, %v767_v25 }
 0x144   : > { %v718_v32 = vmul.f32 %v2225_v30, %v2994_v11  ;;  %v642_v33 = vpop.f32.mrb[5].mxu0  ;;  %v2496_v34 = vpack.i.bf16 %v3017_v28, %v3010_v23  ;;  %v885_v35 = vrot.slane %v3017_v28, 1 }
 0x145   : > { %v3026_v37 = vmul.f32 %v793_v27, %v768_v29  ;;  %v716_v38 = vmul.f32 %v2994_v11, %v642_v33  ;;  %v2226_v39 = vpop.f32.mrb[6].mxu0  ;;  %v881_v56 = vrot.slane %v3024_v36, 1 }
 0x146   : > { %v3030_v40 = vadd.f32 %v2999_v13, %v718_v32  ;;  %v719_v41 = vmul.f32 %v2226_v39, %v2994_v11  ;;  %v645_v42 = vpop.f32.mrb[7].mxu0  ;;  %v3034_v43 = vsel %vm880_vm1, %v884_v31, %v885_v35  ;;  %v3037_v44 = vsel %vm880_vm1, %v885_v35, 0.0 }
 0x147   : > { %v717_v45 = vmul.f32 %v2994_v11, %v645_v42  ;;  %v2476_v46 = vpack.i.bf16 %v3026_v37, %v3024_v36  ;;  %v2506_v49 = vpack.i.bf16 %v3037_v44, %v3034_v43  ;;  %v3051_v50 = vadd.f32 %v2999_v13, %v716_v38 }
 0x148   : > { %v3043_v47 = vmax.f32 %v3030_v40, 0.0  ;;  %v3046_v48 = vadd.f32 %v2999_v13, %v719_v41  ;;  %v882_v52 = vrot.slane %v3026_v37, 1 }
 0x149   : > { %v3054_v51 = vadd.f32 %v2999_v13, %v717_v45  ;;  %v3070_v62 = vmax.f32 %v3051_v50, 0.0 }
 0x14a   : > { %v3058_v53 = vmax.f32 %v3046_v48, 0.0  ;;  %v890_v55 = vrot.slane %v3043_v47, 1  ;;  %v3074_v1 = vsel %vm880_vm1, %v881_v56, %v882_v52  ;;  %v3077_v2 = vsel %vm880_vm1, %v882_v52, 0.0 }
 0x14b   : > { %v2229_v54 = vpop.f32.mrb[8].mxu0  ;;  %v3063_v57 = vmax.f32 %v3054_v51, 0.0  ;;  %v2501_v12 = vpack.i.bf16 %v3077_v2, %v3074_v1  ;;  %v887_v21 = vrot.slane %v3070_v62, 1  ;;  %v2536_v43 = vpack.i.bf16 %v3054_v51, %v3051_v50 }
 0x14c   : > { %v722_v58 = vmul.f32 %v2229_v54, %v2994_v11  ;;  %v658_v59 = vpop.f32.mrb[9].mxu0  ;;  %v2431_v60 = vpack.i.bf16 %v3058_v53, %v3043_v47  ;;  %v891_v61 = vrot.slane %v3058_v53, 1 }
 0x14d   : > { %v720_v63 = vmul.f32 %v2994_v11, %v658_v59  ;;  %v2230_v0 = vpop.f32.mrb[10].mxu0  ;;  %v2511_v16 = vpack.i.bf16 %v3063_v57, %v3070_v62  ;;  %v888_v26 = vrot.slane %v3063_v57, 1 }
 0x14e   : > { %v3080_v3 = vadd.f32 %v2999_v13, %v722_v58  ;;  %v723_v4 = vmul.f32 %v2230_v0, %v2994_v11  ;;  %2432 = vrot.lane.b32.xlu0 %v2431_v60, %s2737_s0  ;;  %v661_v5 = vpop.f32.mrb[11].mxu0  ;;  %v892_v6 = vsel %vm880_vm1, %v890_v55, %v891_v61  ;;  %v924_v7 = vsel %vm880_vm1, %v891_v61, 0.0 }
 0x14f   : > { %v3087_v8 = vadd.f32 %v2999_v13, %v720_v63  ;;  %v721_v9 = vmul.f32 %v2994_v11, %v661_v5  ;;  %v2436_v10 = vpack.i.bf16 %v924_v7, %v892_v6  ;;  %v3155_v7 = vsel %vm880_vm1, %v887_v21, %v888_v26 }
 0x150   : > { %v3094_v14 = vmax.f32 %v3080_v3, 0.0  ;;  %v3097_v15 = vadd.f32 %v2999_v13, %v723_v4 }
 0x151   : > { %v3102_v17 = vmax.f32 %v3087_v8, 0.0  ;;  %v3105_v19 = vadd.f32 %v2999_v13, %v721_v9  ;;  %2437 = vrot.lane.b32.xlu1 %v2436_v10, %s2738_s25 }
 0x152   : > { %v3109_v20 = vmax.f32 %v3097_v15, 0.0  ;;  %v896_v27 = vrot.slane %v3094_v14, 1  ;;  %v2551_v44 = vpack.i.bf16 %v3097_v15, %v3080_v3 }
 0x153   : > { %v3113_v22 = vmax.f32 %v3105_v19, 0.0  ;;  %v2233_v25 = vpop.f32.mrb[12].mxu0  ;;  %v893_v33 = vrot.slane %v3102_v17, 1 }
 0x154   : > { %v726_v29 = vmul.f32 %v2233_v25, %v2994_v11  ;;  %v674_v30 = vpop.f32.mrb[13].mxu0  ;;  %v2446_v31 = vpack.i.bf16 %v3109_v20, %v3094_v14  ;;  %v897_v32 = vrot.slane %v3109_v20, 1 }
 0x155   : > { %v724_v35 = vmul.f32 %v2994_v11, %v674_v30  ;;  %v2234_v38 = vpop.f32.mrb[14].mxu0  ;;  %v2441_v39 = vpack.i.bf16 %v3113_v22, %v3102_v17  ;;  %v894_v41 = vrot.slane %v3113_v22, 1 }
 0x156   : > { %v3129_v42 = vadd.f32 %v2999_v13, %v726_v29  ;;  %v727_v45 = vmul.f32 %v2234_v38, %v2994_v11  ;;  %v677_v52 = vpop.f32.mrb[15].mxu0  ;;  %v898_v54 = vsel %vm880_vm1, %v896_v27, %v897_v32  ;;  %v926_v55 = vsel %vm880_vm1, %v897_v32, 0.0 }
 0x157   : > { %v3135_v56 = vadd.f32 %v2999_v13, %v724_v35  ;;  %v725_v58 = vmul.f32 %v2994_v11, %v677_v52  ;;  %2442 = vrot.lane.b32.xlu0 %v2441_v39, %s2737_s0  ;;  %v895_v59 = vsel %vm880_vm1, %v893_v33, %v894_v41  ;;  %v925_v60 = vsel %vm880_vm1, %v894_v41, 0.0 }
 0x158   : > { %v3143_v61 = vmax.f32 %v3129_v42, 0.0  ;;  %v3146_v63 = vadd.f32 %v2999_v13, %v727_v45  ;;  %v2456_v0 = vpack.i.bf16 %v925_v60, %v895_v59  ;;  %v2451_v4 = vpack.i.bf16 %v926_v55, %v898_v54 }
 0x159   : > { %v3149_v5 = vmax.f32 %v3135_v56, 0.0  ;;  %v3152_v6 = vadd.f32 %v2999_v13, %v725_v58  ;;  %v796_v27 = vstv %s792_s17  ;;  %v3166_v29 = vsel %vm880_vm1, %v888_v26, 0.0  ;;  %s3678_s17 = sld [smem:[#allocation15_spill]] }
 0x15a   : > { %v3158_v9 = vmax.f32 %v3146_v63, 0.0  ;;  %2457 = vrot.lane.b32.xlu1 %v2456_v0, %s2738_s25  ;;  %v902_v30 = vrot.slane %v3143_v61, 1 }
 0x15b   : > { %v3162_v10 = vmax.f32 %v3152_v6, 0.0  ;;  %2447 = vrot.lane.b32.xlu0 %v2446_v31, %s2737_s0  ;;  %v2237_v25 = vpop.f32.mrb[16].mxu0  ;;  %v899_v38 = vrot.slane %v3149_v5, 1 }
 0x15c   : > { %v730_v21 = vmul.f32 %v2237_v25, %v2994_v11  ;;  %v690_v32 = vpop.f32.mrb[17].mxu0  ;;  %v2461_v33 = vpack.i.bf16 %v3158_v9, %v3143_v61  ;;  %v903_v35 = vrot.slane %v3158_v9, 1 }
 0x15d   : > { %v728_v39 = vmul.f32 %v2994_v11, %v690_v32  ;;  %v2238_v31 = vpop.f32.mrb[18].mxu0  ;;  %v2466_v41 = vpack.i.bf16 %v3162_v10, %v3149_v5  ;;  %v900_v26 = vrot.slane %v3162_v10, 1 }
 0x15e   : > { %v757_v45 = vadd.f32 %v2999_v13, %v730_v21  ;;  %v731_v52 = vmul.f32 %v2238_v31, %v2994_v11  ;;  %v693_v54 = vpop.f32.mrb[19].mxu0  ;;  %v904_v55 = vsel %vm880_vm1, %v902_v30, %v903_v35  ;;  %v928_v58 = vsel %vm880_vm1, %v903_v35, 0.0 }
 0x15f   : > { %v3183_v59 = vadd.f32 %v2999_v13, %v728_v39  ;;  %v729_v60 = vmul.f32 %v2994_v11, %v693_v54  ;;  %2452 = vrot.lane.b32.xlu0 %v2451_v4, %s2738_s25  ;;  %2467 = vrot.lane.b32.xlu1 %v2466_v41, %s2737_s0  ;;  %v901_v0 = vsel %vm880_vm1, %v899_v38, %v900_v26  ;;  %v927_v25 = vsel %vm880_vm1, %v900_v26, 0.0 }
 0x160   : > { %v785_v21 = vmax.f32 %v757_v45, 0.0  ;;  %v758_v32 = vadd.f32 %v2999_v13, %v731_v52  ;;  %v2481_v31 = vpack.i.bf16 %v927_v25, %v901_v0  ;;  %v2471_v30 = vpack.i.bf16 %v928_v58, %v904_v55 }
 0x161   : > { %v3192_v35 = vmax.f32 %v3183_v59, 0.0  ;;  %v3195_v39 = vadd.f32 %v2999_v13, %v729_v60  ;;  %v2516_v11 = vpack.i.bf16 %v3166_v29, %v3155_v7  ;;  %v830_v60 = vrot.slane %v3058_v53, 7 }
 0x162   : > { %v3199_v4 = vmul.f32 %v796_v27, %v785_v21  ;;  %v786_v41 = vmax.f32 %v758_v32, 0.0  ;;  %v3657_v32 = vrot.slane %v3043_v47, 7  ;;  %v833_v53 = vrot.slane %v3113_v22, 7  ;;  %v2582_v22 = vld [vmem:[%s3645_s5 + $0x8] sm:$0x3f]  }
 0x163   : > { %v784_v38 = vmax.f32 %v3195_v39, 0.0  ;;  %2462 = vrot.lane.b32.xlu0 %v2461_v33, %s2737_s0  ;;  %2482 = vrot.lane.b32.xlu1 %v2481_v31, %s2738_s25  ;;  %v905_v45 = vrot.slane %v3192_v35, 1  ;;  %v836_v31 = vrot.slane %v3109_v20, 7 }
 0x164   : > { %v798_v26 = vmul.f32 %v796_v27, %v786_v41  ;;  %v908_v55 = vrot.slane %v3199_v4, 1  ;;  %v3233_v20 = vsel %vm819_vm2, %v3657_v32, %v830_v60  ;;  %2346 = vmatprep.subr.msk.bf16.mxu1 %vm1148_vm3, %v2582_v22  ;;  %2345 = vmatprep.subr.msk.bf16.mxu0 %vm1148_vm3, %v2582_v22 }
 0x165   : > { %v2486_v52 = vpack.i.bf16 %v784_v38, %v3192_v35  ;;  %v906_v54 = vrot.slane %v784_v38, 1 }
 0x166   : > { %v2521_v13 = vpack.i.bf16 %v798_v26, %v3199_v4  ;;  %v909_v58 = vrot.slane %v798_v26, 1  ;;  %v848_v32 = vrot.slane %v798_v26, 7  ;;  %v1150_v26 = vsel %vm1148_vm3, %v2582_v22, 0 }
 0x167   : > { %2472 = vrot.lane.b32.xlu0 %v2471_v30, %s2738_s25  ;;  %2487 = vrot.lane.b32.xlu1 %v2486_v52, %s2737_s0  ;;  %v907_v33 = vsel %vm880_vm1, %v905_v45, %v906_v54  ;;  %v929_v27 = vsel %vm880_vm1, %v906_v54, 0.0  ;;  %v823_v30 = vrot.slane %v3010_v23, 7  ;;  %v820_v52 = vrot.slane %v3024_v36, 7 }
 0x168   : > { %v2491_v0 = vpack.i.bf16 %v929_v27, %v907_v33  ;;  %v910_v25 = vsel %vm880_vm1, %v908_v55, %v909_v58  ;;  %v930_v21 = vsel %vm880_vm1, %v909_v58, 0.0  ;;  %v824_v45 = vrot.slane %v3017_v28, 7  ;;  %2312 = vmatpush3.bf16.msra.mxu1 %v1150_v26  ;;  %2240 = vmatpush3.bf16.msra.mxu0 %v1150_v26 }
 0x169   : > { %v2526_v41 = vpack.i.bf16 %v930_v21, %v910_v25  ;;  %v839_v54 = vrot.slane %v3162_v10, 7  ;;  %v835_v55 = vrot.slane %v3094_v14, 7  ;;  %v832_v58 = vrot.slane %v3102_v17, 7 }
 0x16a   : > { %v842_v33 = vrot.slane %v3158_v9, 7  ;;  %v821_v10 = vrot.slane %v3026_v37, 7  ;;  %v827_v9 = vrot.slane %v3063_v57, 7  ;;  %v838_v27 = vrot.slane %v3149_v5, 7 }
 0x16b   : > { %2477 = vrot.lane.b32.xlu0 %v2476_v46, %s2737_s0  ;;  %2492 = vrot.lane.b32.xlu1 %v2491_v0, %s2738_s25  ;;  %v845_v25 = vrot.slane %v784_v38, 7  ;;  %v841_v46 = vrot.slane %v3143_v61, 7  ;;  %v847_v0 = vrot.slane %v3199_v4, 7  ;;  %v3246_v60 = vsel %vm819_vm2, %v832_v58, %v833_v53  ;;  %v3262_v4 = vld [vmem:[%s3645_s5] sm:$0x3f]  }
 0x16c   : > { %v3251_v21 = vsel %vm819_vm2, %v835_v55, %v836_v31  ;;  %v844_v37 = vrot.slane %v3192_v35, 7  ;;  %v3257_v38 = vsel %vm819_vm2, %v838_v27, %v839_v54  ;;  %v826_v53 = vrot.slane %v3070_v62, 7  ;;  %2347 = vmatprep.subr.msk.bf16.mxu1 %vm1148_vm3, %v3262_v4 }
 0x16d   : > { %v3277_v31 = vsel %vm819_vm2, %v841_v46, %v842_v33  ;;  %v3288_v1 = vsel %vm819_vm2, %v820_v52, %v821_v10  ;;  %v3293_v28 = vsel %vm819_vm2, %v823_v30, %v824_v45  ;;  %v3302_v2 = vsel %vm819_vm2, 0.0, %v847_v0 }
 0x16e   : > { %v3283_v54 = vsel %vm819_vm2, %v844_v37, %v845_v25  ;;  %v2541_v57 = vpack.i.bf16 %v3046_v48, %v3030_v40  ;;  %v2566_v40 = vpack.i.bf16 %v3195_v39, %v3183_v59  ;;  %v1258_v17 = vsel %vm1148_vm3, %v3262_v4, 0 }
 0x16f   : > { %2502 = vrot.lane.b32.xlu0 %v2501_v12, %s2738_s25  ;;  %2497 = vrot.lane.b32.xlu1 %v2496_v34, %s2737_s0  ;;  %v3299_v34 = vsel %vm819_vm2, %v826_v53, %v827_v9  ;;  %v3307_v12 = vsel %vm819_vm2, %v847_v0, %v848_v32  ;;  %v2531_v32 = vpack.i.bf16 %v3013_v24, %v3004_v18 }
 0x170   : > { %v2561_v18 = vpack.i.bf16 %v3146_v63, %v3129_v42  ;;  %v2556_v24 = vpack.i.bf16 %v3152_v6, %v3135_v56 }
 0x173   : > { %2512 = vrot.lane.b32.xlu0 %v2511_v16, %s2737_s0  ;;  %2507 = vrot.lane.b32.xlu1 %v2506_v49, %s2738_s25  ;;  %v2546_v49 = vpack.i.bf16 %v3105_v19, %v3087_v8  ;;  %v3675_v8 = vrot.slane %v3043_v47, 7 }
 0x175   : > { %v873_v15 = vsel %vm819_vm2, 0.0, %v3675_v8 }
 0x177   : > { %2522 = vrot.lane.b32.xlu0 %v2521_v13, %s2737_s0  ;;  %2517 = vrot.lane.b32.xlu1 %v2516_v11, %s2738_s25  ;;  %v874_v11 = vsel %vm819_vm2, 0.0, %v832_v58  ;;  %v3366_v58 = vld [vmem:[%s3645_s5 + $0x10] sm:$0x3f]   ;;  %s2065_s0 = sshll.u32 %s2715_s20, 3 }
 0x178   : > { %p474_p9 = scmp.lt.s32.totalorder %s2065_s0, 15 }
 0x17a   : > { %s3700_s0 = smov (!%p474_p9, %s2065_s0), 15 }
 0x17b   : > { %2532 = vrot.lane.b32.xlu0 %v2531_v32, %s2739_s28  ;;  %2527 = vrot.lane.b32.xlu1 %v2526_v41, %s2738_s25  ;;  %s2066_s29 = sshll.u32 %s3700_s0, 1 }
 0x17c   : > { %s478_s20 = sadd.s32 %s2067_s10, %s2066_s29 }
 0x17d   : > { %s2068_s15 = sshll.u32 %s478_s20, 2 }
 0x17e   : > { %s3558_s12 = scalar_lea.vmem %s3680_s11, %s2068_s15 }
 0x17f   : > { %2542 = vrot.lane.b32.xlu0 %v2541_v57, %s2739_s28  ;;  %2537 = vrot.lane.b32.xlu1 %v2536_v43, %s2739_s28 }
 0x183   : > { %2552 = vrot.lane.b32.xlu0 %v2551_v44, %s2739_s28  ;;  %2547 = vrot.lane.b32.xlu1 %v2546_v49, %s2739_s28 }
 0x187   : > { %2562 = vrot.lane.b32.xlu0 %v2561_v18, %s2739_s28  ;;  %2557 = vrot.lane.b32.xlu1 %v2556_v24, %s2739_s28 }
 0x18b   : > { %2567 = vrot.lane.b32.xlu1 %v2566_v40, %s2739_s28  ;;  %s3679_s28 = sld [smem:[#allocation16_spill]] }
 0x1c0   : > { %v2433_v48 = vpop.permute.xlu0 %2432 }
 0x1c1   : > { %v2435_v50 = vunpack.i.h.bf16 %v2433_v48  ;;  %v2434_v51 = vunpack.i.l.bf16 %v2433_v48 }
 0x1c3   : > { %v2438_v3 = vpop.permute.xlu1 %2437  ;;  %v1068_v42 = vsel %vm1061_vm4, %v873_v15, %v2434_v51  ;;  %v1069_v56 = vsel %vm1061_vm4, %v3233_v20, %v2435_v50 }
 0x1c4   : > { %v2440_v16 = vunpack.i.h.bf16 %v2438_v3  ;;  %v2439_v19 = vunpack.i.l.bf16 %v2438_v3 }
 0x1c6   : > { %v1089_v63 = vsel %vm1082_vm5, %v1068_v42, %v2439_v19  ;;  %v1090_v6 = vsel %vm1082_vm5, %v1069_v56, %v2440_v16 }
 0x1c7   : > { %v3347_v7 = vpack.c.bf16 %v1090_v6, %v1089_v63  ;;  %v877_v63 = vsel %vm819_vm2, 0.0, %v841_v46 }
 0x1c9   : > { %2245 = vmatprep.mubr.msk.bf16.mxu1 %vm1123_vm6, %v3347_v7  ;;  %v2443_v47 = vpop.permute.xlu0 %2442 }
 0x1ca   : > { %v2445_v29 = vunpack.i.h.bf16 %v2443_v47  ;;  %v2444_v59 = vunpack.i.l.bf16 %v2443_v47 }
 0x1cc   : > { %v2458_v39 = vpop.permute.xlu1 %2457  ;;  %v1070_v33 = vsel %vm1061_vm4, %v874_v11, %v2444_v59  ;;  %v1071_v20 = vsel %vm1061_vm4, %v3246_v60, %v2445_v29  ;;  %v875_v60 = vsel %vm819_vm2, 0.0, %v835_v55 }
 0x1cd   : > { %v2460_v13 = vunpack.i.h.bf16 %v2458_v39  ;;  %v2459_v41 = vunpack.i.l.bf16 %v2458_v39  ;;  %v2448_v45 = vpop.permute.xlu0 %2447 }
 0x1ce   : > { %v2450_v9 = vunpack.i.h.bf16 %v2448_v45  ;;  %v2449_v25 = vunpack.i.l.bf16 %v2448_v45  ;;  %v878_v45 = vsel %vm819_vm2, 0.0, %v844_v37 }
 0x1cf   : > { %v1091_v22 = vsel %vm1082_vm5, %v1070_v33, %v2459_v41  ;;  %v1092_v10 = vsel %vm1082_vm5, %v1071_v20, %v2460_v13 }
 0x1d0   : > { %v3359_v0 = vpack.c.bf16 %v1092_v10, %v1091_v22  ;;  %v1073_v44 = vsel %vm1061_vm4, %v3251_v21, %v2450_v9  ;;  %v1072_v4 = vsel %vm1061_vm4, %v875_v60, %v2449_v25  ;;  %v876_v21 = vsel %vm819_vm2, 0.0, %v838_v27 }
 0x1d1   : > { %v2453_v26 = vpop.permute.xlu0 %2452  ;;  %v2468_v32 = vpop.permute.xlu1 %2467 }
 0x1d2   : > { %v2455_v57 = vunpack.i.h.bf16 %v2453_v26  ;;  %v2454_v43 = vunpack.i.l.bf16 %v2453_v26  ;;  %2246 = vmatmul.mubr.msk.bf16.vlgmr.msra.gmra.mrb[0].mxu1 %vm1123_vm6, %v3359_v0  ;;  %v2470_v49 = vunpack.i.h.bf16 %v2468_v32  ;;  %v2469_v18 = vunpack.i.l.bf16 %v2468_v32 }
 0x1d3   : > { %2258 = vmatpush3.bf16.msra.mxu1 %v1258_v17  ;;  %v870_v32 = vsel %vm819_vm2, 0.0, %v820_v52  ;;  %v871_v52 = vsel %vm819_vm2, 0.0, %v823_v30  ;;  %v1369_v30 = vsel %vm1148_vm3, %v3366_v58, 0 }
 0x1d4   : > { %v1093_v24 = vsel %vm1082_vm5, %v1072_v4, %v2454_v43  ;;  %v1094_v40 = vsel %vm1082_vm5, %v1073_v44, %v2455_v57  ;;  %2348 = vmatprep.subr.msk.bf16.mxu1 %vm1148_vm3, %v3366_v58  ;;  %v1074_v3 = vsel %vm1061_vm4, %v876_v21, %v2469_v18  ;;  %v1075_v8 = vsel %vm1061_vm4, %v3257_v38, %v2470_v49 }
 0x1d5   : > { %v3380_v14 = vpack.c.bf16 %v1094_v40, %v1093_v24  ;;  %v2463_v55 = vpop.permute.xlu0 %2462  ;;  %v2483_v48 = vpop.permute.xlu1 %2482 }
 0x1d6   : > { %v2485_v50 = vunpack.i.h.bf16 %v2483_v48  ;;  %v2484_v51 = vunpack.i.l.bf16 %v2483_v48  ;;  %v2465_v15 = vunpack.i.h.bf16 %v2463_v55  ;;  %v2464_v16 = vunpack.i.l.bf16 %v2463_v55 }
 0x1d7   : > { %2249 = vmatprep.mubr.msk.bf16.mxu1 %vm1123_vm6, %v3380_v14 }
 0x1d8   : > { %v1095_v19 = vsel %vm1082_vm5, %v1074_v3, %v2484_v51  ;;  %v1096_v42 = vsel %vm1082_vm5, %v1075_v8, %v2485_v50  ;;  %v1076_v38 = vsel %vm1061_vm4, %v877_v63, %v2464_v16  ;;  %v1077_v29 = vsel %vm1061_vm4, %v3277_v31, %v2465_v15 }
 0x1d9   : > { %v3392_v56 = vpack.c.bf16 %v1096_v42, %v1095_v19  ;;  %v2473_v5 = vpop.permute.xlu0 %2472  ;;  %v2488_v27 = vpop.permute.xlu1 %2487 }
 0x1da   : > { %v2475_v6 = vunpack.i.h.bf16 %v2473_v5  ;;  %v2474_v47 = vunpack.i.l.bf16 %v2473_v5  ;;  %v2490_v59 = vunpack.i.h.bf16 %v2488_v27  ;;  %v2489_v39 = vunpack.i.l.bf16 %v2488_v27 }
 0x1db   : > { %2250 = vmatmul.mubr.msk.bf16.gmra.mrb[4].mxu1 %vm1123_vm6, %v3392_v56 }
 0x1dc   : > { %v1097_v11 = vsel %vm1082_vm5, %v1076_v38, %v2474_v47  ;;  %v1098_v13 = vsel %vm1082_vm5, %v1077_v29, %v2475_v6  ;;  %v1078_v31 = vsel %vm1061_vm4, %v878_v45, %v2489_v39  ;;  %v1079_v22 = vsel %vm1061_vm4, %v3283_v54, %v2490_v59 }
 0x1dd   : > { %v3404_v41 = vpack.c.bf16 %v1098_v13, %v1097_v11  ;;  %v2478_v61 = vpop.permute.xlu0 %2477  ;;  %v2493_v46 = vpop.permute.xlu1 %2492 }
 0x1de   : > { %v2495_v33 = vunpack.i.h.bf16 %v2493_v46  ;;  %v2494_v20 = vunpack.i.l.bf16 %v2493_v46  ;;  %v2480_v10 = vunpack.i.h.bf16 %v2478_v61  ;;  %v2479_v9 = vunpack.i.l.bf16 %v2478_v61 }
 0x1df   : > { %2253 = vmatprep.mubr.msk.bf16.mxu1 %vm1123_vm6, %v3404_v41 }
 0x1e0   : > { %v1099_v25 = vsel %vm1082_vm5, %v1078_v31, %v2494_v20  ;;  %v1100_v17 = vsel %vm1082_vm5, %v1079_v22, %v2495_v33  ;;  %v1063_v54 = vsel %vm1061_vm4, %v3288_v1, %v2480_v10  ;;  %v1062_v43 = vsel %vm1061_vm4, %v870_v32, %v2479_v9  ;;  %v3492_v33 = vld [vmem:[%s3676_s9] ss:$0 sm:$0xff] }
 0x1e1   : > { %v3416_v26 = vpack.c.bf16 %v1100_v17, %v1099_v25  ;;  %v2503_v35 = vpop.permute.xlu0 %2502  ;;  %v2498_v37 = vpop.permute.xlu1 %2497 }
 0x1e2   : > { %v2505_v60 = vunpack.i.h.bf16 %v2503_v35  ;;  %v2504_v57 = vunpack.i.l.bf16 %v2503_v35  ;;  %v2500_v44 = vunpack.i.h.bf16 %v2498_v37  ;;  %v2499_v4 = vunpack.i.l.bf16 %v2498_v37 }
 0x1e3   : > { %2254 = vmatmul.mubr.msk.bf16.gmra.mrb[8].mxu1 %vm1123_vm6, %v3416_v26 }
 0x1e4   : > { %v1083_v49 = vsel %vm1082_vm5, %v1062_v43, %v2504_v57  ;;  %v1084_v18 = vsel %vm1082_vm5, %v1063_v54, %v2505_v60  ;;  %v1065_v48 = vsel %vm1061_vm4, %v3293_v28, %v2500_v44  ;;  %v1064_v21 = vsel %vm1061_vm4, %v871_v52, %v2499_v4 }
 0x1e5   : > { %v1103_v24 = vpack.c.bf16 %v1084_v18, %v1083_v49  ;;  %v2513_v36 = vpop.permute.xlu0 %2512  ;;  %v2508_v40 = vpop.permute.xlu1 %2507  ;;  %v872_v28 = vsel %vm819_vm2, 0.0, %v826_v53 }
 0x1e6   : > { %v2510_v55 = vunpack.i.h.bf16 %v2508_v40  ;;  %v2509_v1 = vunpack.i.l.bf16 %v2508_v40  ;;  %v2515_v50 = vunpack.i.h.bf16 %v2513_v36  ;;  %v2514_v51 = vunpack.i.l.bf16 %v2513_v36 }
 0x1e7   : > { %2259 = vmatprep.mubr.msk.bf16.mxu1 %vm1123_vm6, %v1103_v24 }
 0x1e8   : > { %v1085_v3 = vsel %vm1082_vm5, %v1064_v21, %v2509_v1  ;;  %v1086_v8 = vsel %vm1082_vm5, %v1065_v48, %v2510_v55  ;;  %v1067_v5 = vsel %vm1061_vm4, %v3299_v34, %v2515_v50  ;;  %v1066_v27 = vsel %vm1061_vm4, %v872_v28, %v2514_v51 }
 0x1e9   : > { %v1104_v15 = vpack.c.bf16 %v1086_v8, %v1085_v3  ;;  %v2523_v16 = vpop.permute.xlu0 %2522  ;;  %v2518_v23 = vpop.permute.xlu1 %2517 }
 0x1ea   : > { %v2520_v19 = vunpack.i.h.bf16 %v2518_v23  ;;  %v2519_v42 = vunpack.i.l.bf16 %v2518_v23  ;;  %v2525_v63 = vunpack.i.h.bf16 %v2523_v16  ;;  %v2524_v6 = vunpack.i.l.bf16 %v2523_v16 }
 0x1eb   : > { %2241 = vmatprep.mubr.msk.bf16.mxu0 %vm1123_vm6, %v1104_v15  ;;  %2260 = vmatmul.mubr.msk.bf16.vlgmr.msra.gmra.mrb[12].mxu1 %vm1123_vm6, %v1104_v15 }
 0x1ec   : > { %v1088_v47 = vsel %vm1082_vm5, %v1067_v5, %v2520_v19  ;;  %v1087_v58 = vsel %vm1082_vm5, %v1066_v27, %v2519_v42  ;;  %2276 = vmatpush3.bf16.msra.mxu1 %v1369_v30  ;;  %v1080_v34 = vsel %vm1061_vm4, %v3302_v2, %v2524_v6  ;;  %v1081_v59 = vsel %vm1061_vm4, %v3307_v12, %v2525_v63  ;;  %v1554_v2 = vld [vmem:[%s3648_s8] sm:$0x3] }
 0x1ed   : > { %v1105_v62 = vpack.c.bf16 %v1088_v47, %v1087_v58  ;;  %v2528_v53 = vpop.permute.xlu1 %2527  ;;  %2349 = vmatprep.subr.msk.bf16.mxu0 %vm1579_vm7, %v1554_v2  ;;  %v1581_v12 = vsel %vm1579_vm7, %v1554_v2, 0 }
 0x1ee   : > { %v2530_v38 = vunpack.i.h.bf16 %v2528_v53  ;;  %v2529_v29 = vunpack.i.l.bf16 %v2528_v53 }
 0x1ef   : > { %2242 = vmatmul.mubr.msk.bf16.vlgmr.msra.gmra.mrb[20].mxu0 %vm1123_vm6, %v1105_v62  ;;  %2263 = vmatprep.mubr.msk.bf16.mxu1 %vm1123_vm6, %v1105_v62 }
 0x1f0   : > { %v1102_v39 = vsel %vm1082_vm5, %v1081_v59, %v2530_v38  ;;  %v1101_v11 = vsel %vm1082_vm5, %v1080_v34, %v2529_v29  ;;  %2294 = vmatpush3.bf16.msra.mxu0 %v1581_v12 }
 0x1f1   : > { %v1112_v13 = vpack.c.bf16 %v1102_v39, %v1101_v11 }
 0x1f3   : > { %2264 = vmatmul.mubr.msk.bf16.gmra.mrb[0].mxu1 %vm1123_vm6, %v3347_v7 }
 0x1f4   : > { %2267 = vmatprep.mubr.msk.bf16.mxu1 %vm1123_vm6, %v3359_v0 }
 0x1fb   : > { %2268 = vmatmul.mubr.msk.bf16.gmra.mrb[4].mxu1 %vm1123_vm6, %v3380_v14 }
 0x1fc   : > { %2271 = vmatprep.mubr.msk.bf16.mxu1 %vm1123_vm6, %v3392_v56 }
 0x203   : > { %2272 = vmatmul.mubr.msk.bf16.gmra.mrb[8].mxu1 %vm1123_vm6, %v3404_v41 }
 0x204   : > { %2277 = vmatprep.mubr.msk.bf16.mxu1 %vm1123_vm6, %v1105_v62 }
 0x20b   : > { %2278 = vmatmul.mubr.msk.bf16.vlgmr.msra.gmra.mrb[12].mxu1 %vm1123_vm6, %v3347_v7 }
 0x20c   : > { %2281 = vmatprep.mubr.msk.bf16.mxu1 %vm1123_vm6, %v3359_v0 }
 0x213   : > { %2282 = vmatmul.mubr.msk.bf16.gmra.mrb[0].mxu1 %vm1123_vm6, %v3380_v14 }
 0x214   : > { %2285 = vmatprep.mubr.msk.bf16.mxu1 %vm1123_vm6, %v3392_v56 }
 0x21b   : > { %2286 = vmatmul.mubr.msk.bf16.gmra.mrb[4].mxu1 %vm1123_vm6, %v3404_v41  ;;  %v3487_v41 = vld [vmem:[%s3646_s6] ss:$0 sm:$0xff] }
 0x21c   : > { %2289 = vmatprep.mubr.msk.bf16.mxu1 %vm1123_vm6, %v3416_v26 }
 0x223   : > { %2290 = vmatmul.mubr.msk.bf16.gmra.mrb[8].mxu1 %vm1123_vm6, %v1112_v13 }
 0x2c2   : > { %v2243_v7 = vpop.f32.mrb[20].mxu0 }
 0x2c3   : > { %v1186_v0 = vpop.f32.mrb[21].mxu0 }
 0x2c4   : > { %v2244_v14 = vpop.f32.mrb[22].mxu0 }
 0x2c5   : > { %v1189_v56 = vpop.f32.mrb[23].mxu0 }
 0x2de   : > { %v2279_v61 = vpop.f32.mrb[12].mxu1 }
 0x2df   : > { %v2313_v46 = vadd.f32 %v2279_v61, %v2243_v7  ;;  %v1405_v45 = vpop.f32.mrb[13].mxu1 }
 0x2e0   : > { %v2314_v20 = vadd.f32 %v1405_v45, %v1186_v0  ;;  %v2280_v31 = vpop.f32.mrb[14].mxu1 }
 0x2e1   : > { %v1493_v22 = vmul.f32 %v2313_v46, %v3487_v41  ;;  %v2315_v10 = vadd.f32 %v2280_v31, %v2244_v14  ;;  %v1408_v9 = vpop.f32.mrb[15].mxu1 }
 0x2e2   : > { %v1491_v25 = vmul.f32 %v2314_v20, %v3487_v41  ;;  %v2316_v17 = vadd.f32 %v1408_v9, %v1189_v56 }
 0x2e3   : > { %v1516_v26 = vadd.f32 %v3492_v33, %v1493_v22  ;;  %v1494_v35 = vmul.f32 %v2315_v10, %v3487_v41 }
 0x2e4   : > { %v1514_v37 = vadd.f32 %v3492_v33, %v1491_v25  ;;  %v1492_v32 = vmul.f32 %v2316_v17, %v3487_v41 }
 0x2e5   : > { %v1517_v60 = vadd.f32 %v3492_v33, %v1494_v35  ;;  %v1532_v43 = vmax.f32 %v1516_v26, 0.0 }
 0x2e6   : > { %v1515_v57 = vadd.f32 %v3492_v33, %v1492_v32  ;;  %v2283_v54 = vpop.f32.mrb[0].mxu1  ;;  %v1530_v18 = vmax.f32 %v1514_v37, 0.0 }
 0x2e7   : > { %v1533_v44 = vmax.f32 %v1517_v60, 0.0  ;;  %v1497_v4 = vmul.f32 %v2283_v54, %v3487_v41  ;;  %v1421_v49 = vpop.f32.mrb[1].mxu1  ;;  %v2533_v54 = vpop.permute.xlu0 %2532 }
 0x2e8   : > { %v1531_v24 = vmax.f32 %v1515_v57, 0.0  ;;  %v1495_v36 = vmul.f32 %v3487_v41, %v1421_v49  ;;  %v2284_v40 = vpop.f32.mrb[2].mxu1  ;;  %v3545_v57 = vld [vmem:[%s3679_s28] ss:$0 sm:$0xff] }
 0x2e9   : > { %v1547_v52 = vpack.c.bf16 %v1533_v44, %v1532_v43  ;;  %v1520_v55 = vadd.f32 %v3492_v33, %v1497_v4  ;;  %v1498_v1 = vmul.f32 %v2284_v40, %v3487_v41  ;;  %v1424_v48 = vpop.f32.mrb[3].mxu1 }
 0x2ea   : > { %v1546_v21 = vpack.c.bf16 %v1531_v24, %v1530_v18  ;;  %v1518_v50 = vadd.f32 %v3492_v33, %v1495_v36  ;;  %v1496_v51 = vmul.f32 %v3487_v41, %v1424_v48 }
 0x2eb   : > { %v1521_v3 = vadd.f32 %v3492_v33, %v1498_v1  ;;  %v1536_v15 = vmax.f32 %v1520_v55, 0.0 }
 0x2ec   : > { %v1519_v8 = vadd.f32 %v3492_v33, %v1496_v51  ;;  %2295 = vmatprep.mubr.msk.bf16.mxu0 %vm1061_vm4, %v1546_v21  ;;  %v1534_v23 = vmax.f32 %v1518_v50, 0.0 }
 0x2ed   : > { %v1537_v16 = vmax.f32 %v1521_v3, 0.0  ;;  %2296 = vmatmul.mubr.msk.bf16.vlgmr.msra.gmra.mrb[24].mxu0 %vm1061_vm4, %v1547_v52 }
 0x2ee   : > { %v1535_v30 = vmax.f32 %v1519_v8, 0.0  ;;  %v2287_v28 = vpop.f32.mrb[4].mxu1 }
 0x2ef   : > { %v1549_v19 = vpack.c.bf16 %v1537_v16, %v1536_v15  ;;  %v1501_v42 = vmul.f32 %v2287_v28, %v3487_v41  ;;  %v1437_v5 = vpop.f32.mrb[5].mxu1 }
 0x2f0   : > { %v1548_v27 = vpack.c.bf16 %v1535_v30, %v1534_v23  ;;  %v1499_v63 = vmul.f32 %v3487_v41, %v1437_v5  ;;  %v2288_v6 = vpop.f32.mrb[6].mxu1  ;;  %v2543_v23 = vpop.permute.xlu0 %2542 }
 0x2f1   : > { %v1524_v47 = vadd.f32 %v3492_v33, %v1501_v42  ;;  %v1502_v58 = vmul.f32 %v2288_v6, %v3487_v41  ;;  %v1440_v62 = vpop.f32.mrb[7].mxu1 }
 0x2f2   : > { %v1522_v53 = vadd.f32 %v3492_v33, %v1499_v63  ;;  %v1500_v38 = vmul.f32 %v3487_v41, %v1440_v62  ;;  %2299 = vmatprep.mubr.msk.bf16.mxu0 %vm1061_vm4, %v1548_v27 }
 0x2f3   : > { %v1525_v29 = vadd.f32 %v3492_v33, %v1502_v58  ;;  %v1540_v59 = vmax.f32 %v1524_v47, 0.0 }
 0x2f4   : > { %v1523_v34 = vadd.f32 %v3492_v33, %v1500_v38  ;;  %v1538_v11 = vmax.f32 %v1522_v53, 0.0 }
 0x2f5   : > { %v1541_v39 = vmax.f32 %v1525_v29, 0.0  ;;  %2300 = vmatmul.mubr.msk.bf16.gmra.mrb[28].mxu0 %vm1061_vm4, %v1549_v19 }
 0x2f6   : > { %v1539_v13 = vmax.f32 %v1523_v34, 0.0  ;;  %v2291_v2 = vpop.f32.mrb[8].mxu1 }
 0x2f7   : > { %v1551_v12 = vpack.c.bf16 %v1541_v39, %v1540_v59  ;;  %v1505_v7 = vmul.f32 %v2291_v2, %v3487_v41  ;;  %v1453_v0 = vpop.f32.mrb[9].mxu1 }
 0x2f8   : > { %v1550_v14 = vpack.c.bf16 %v1539_v13, %v1538_v11  ;;  %v1503_v56 = vmul.f32 %v3487_v41, %v1453_v0  ;;  %v2292_v61 = vpop.f32.mrb[10].mxu1 }
 0x2f9   : > { %v1528_v46 = vadd.f32 %v3492_v33, %v1505_v7  ;;  %v1506_v45 = vmul.f32 %v2292_v61, %v3487_v41  ;;  %v1456_v20 = vpop.f32.mrb[11].mxu1  ;;  %v2553_v61 = vpop.permute.xlu0 %2552 }
 0x2fa   : > { %v1526_v31 = vadd.f32 %v3492_v33, %v1503_v56  ;;  %v1504_v22 = vmul.f32 %v3487_v41, %v1456_v20  ;;  %2303 = vmatprep.mubr.msk.bf16.mxu0 %vm1061_vm4, %v1550_v14  ;;  %v3540_v41 = vld [vmem:[%s3678_s17] ss:$0 sm:$0xff] }
 0x2fb   : > { %v1529_v10 = vadd.f32 %v3492_v33, %v1506_v45  ;;  %v1544_v25 = vmax.f32 %v1528_v46, 0.0 }
 0x2fc   : > { %v1527_v9 = vadd.f32 %v3492_v33, %v1504_v22  ;;  %v1542_v26 = vmax.f32 %v1526_v31, 0.0  ;;  %v2538_v33 = vpop.permute.xlu1 %2537 }
 0x2fd   : > { %v1545_v17 = vmax.f32 %v1529_v10, 0.0  ;;  %2304 = vmatmul.mubr.msk.bf16.gmra.mrb[32].mxu0 %vm1061_vm4, %v1551_v12 }
 0x2fe   : > { %v1543_v35 = vmax.f32 %v1527_v9, 0.0 }
 0x2ff   : > { %v1553_v37 = vpack.c.bf16 %v1545_v17, %v1544_v25 }
 0x300   : > { %v1552_v32 = vpack.c.bf16 %v1543_v35, %v1542_v26  ;;  %v2548_v3 = vpop.permute.xlu1 %2547 }
 0x302   : > { %2307 = vmatprep.mubr.msk.bf16.mxu0 %vm1061_vm4, %v1552_v32 }
 0x304   : > { %v2558_v7 = vpop.permute.xlu1 %2557 }
 0x305   : > { %2308 = vmatmul.mubr.msk.bf16.gmra.mrb[36].mxu0 %vm1061_vm4, %v1553_v37 }
 0x3c0   : > { %v2297_v60 = vpop.f32.mrb[24].mxu0 }
 0x3c1   : > { %v1689_v43 = vmul.f32 %v2297_v60, %v3540_v41  ;;  %v1617_v44 = vpop.f32.mrb[25].mxu0 }
 0x3c2   : > { %v1687_v4 = vmul.f32 %v3540_v41, %v1617_v44  ;;  %v2298_v49 = vpop.f32.mrb[26].mxu0 }
 0x3c3   : > { %v1712_v18 = vadd.f32 %v3545_v57, %v1689_v43  ;;  %v1690_v24 = vmul.f32 %v2298_v49, %v3540_v41  ;;  %v1620_v36 = vpop.f32.mrb[27].mxu0 }
 0x3c4   : > { %v1710_v40 = vadd.f32 %v3545_v57, %v1687_v4  ;;  %v1688_v52 = vmul.f32 %v3540_v41, %v1620_v36 }
 0x3c5   : > { %v2585_v55 = vadd.low.f32.bf16 %v1712_v18, %v2538_v33  ;;  %v1713_v1 = vadd.f32 %v3545_v57, %v1690_v24  ;;  %v2568_v24 = vpop.permute.xlu1 %2567 }
 0x3c6   : > { %v2586_v48 = vadd.low.f32.bf16 %v1710_v40, %v2533_v54  ;;  %v1711_v21 = vadd.f32 %v3545_v57, %v1688_v52 }
 0x3c7   : > { %v1824_v50 = vmax.f32 %v2585_v55, 0.0  ;;  %v2587_v51 = vadd.high.f32.bf16 %v1713_v1, %v2538_v33  ;;  %v2563_v55 = vpop.permute.xlu0 %2562 }
 0x3c8   : > { %v1822_v8 = vmax.f32 %v2586_v48, 0.0  ;;  %v2588_v15 = vadd.high.f32.bf16 %v1711_v21, %v2533_v54  ;;  %v2301_v16 = vpop.f32.mrb[28].mxu0 }
 0x3c9   : > { %v2156_v30 = vpack.c.bf16 %v1824_v50, %v1824_v50  ;;  %v1825_v28 = vmax.f32 %v2587_v51, 0.0  ;;  %v1693_v19 = vmul.f32 %v2301_v16, %v3540_v41  ;;  %v1633_v42 = vpop.f32.mrb[29].mxu0 }
 0x3ca   : > { %v2154_v5 = vpack.c.bf16 %v1822_v8, %v1822_v8  ;;  %v1823_v27 = vmax.f32 %v2588_v15, 0.0  ;;  %v1691_v63 = vmul.f32 %v3540_v41, %v1633_v42  ;;  %v2302_v6 = vpop.f32.mrb[30].mxu0 }
 0x3cb   : > { %1905 = vst.msk [vmem:[%s3558_s12 + $0x8] sm:$0xf] %vm1902_vm8, %v2156_v30  ;;  %v2157_v47 = vpack.c.bf16 %v1825_v28, %v1825_v28  ;;  %v1716_v58 = vadd.f32 %v3545_v57, %v1693_v19  ;;  %v1694_v62 = vmul.f32 %v2302_v6, %v3540_v41  ;;  %v1636_v53 = vpop.f32.mrb[31].mxu0 }
 0x3cc   : > { %1903 = vst.msk [vmem:[%s3558_s12] sm:$0xf] %vm1902_vm8, %v2154_v5  ;;  %v2155_v38 = vpack.c.bf16 %v1823_v27, %v1823_v27  ;;  %v1714_v29 = vadd.f32 %v3545_v57, %v1691_v63  ;;  %v1692_v34 = vmul.f32 %v3540_v41, %v1636_v53 }
 0x3cd   : > { %1906 = vst.msk [vmem:[%s3558_s12 + $0xc] sm:$0xf] %vm1902_vm8, %v2157_v47  ;;  %v2589_v59 = vadd.low.f32.bf16 %v1716_v58, %v2548_v3  ;;  %v1717_v39 = vadd.f32 %v3545_v57, %v1694_v62 }
 0x3ce   : > { %1904 = vst.msk [vmem:[%s3558_s12 + $0x4] sm:$0xf] %vm1902_vm8, %v2155_v38  ;;  %v2590_v11 = vadd.low.f32.bf16 %v1714_v29, %v2543_v23  ;;  %v1715_v13 = vadd.f32 %v3545_v57, %v1692_v34 }
 0x3cf   : > { %v1828_v2 = vmax.f32 %v2589_v59, 0.0  ;;  %v2591_v12 = vadd.high.f32.bf16 %v1717_v39, %v2548_v3 }
 0x3d0   : > { %v1826_v0 = vmax.f32 %v2590_v11, 0.0  ;;  %v2592_v14 = vadd.high.f32.bf16 %v1715_v13, %v2543_v23  ;;  %v2305_v56 = vpop.f32.mrb[32].mxu0 }
 0x3d1   : > { %v2160_v46 = vpack.c.bf16 %v1828_v2, %v1828_v2  ;;  %v1829_v45 = vmax.f32 %v2591_v12, 0.0  ;;  %v1697_v20 = vmul.f32 %v2305_v56, %v3540_v41  ;;  %v1649_v31 = vpop.f32.mrb[33].mxu0 }
 0x3d2   : > { %v2158_v22 = vpack.c.bf16 %v1826_v0, %v1826_v0  ;;  %v1827_v10 = vmax.f32 %v2592_v14, 0.0  ;;  %v1695_v9 = vmul.f32 %v3540_v41, %v1649_v31  ;;  %v2306_v25 = vpop.f32.mrb[34].mxu0 }
 0x3d3   : > { %1909 = vst.msk [vmem:[%s3558_s12 + $0x18] sm:$0xf] %vm1902_vm8, %v2160_v46  ;;  %v2161_v17 = vpack.c.bf16 %v1829_v45, %v1829_v45  ;;  %v1720_v26 = vadd.f32 %v3545_v57, %v1697_v20  ;;  %v1698_v35 = vmul.f32 %v2306_v25, %v3540_v41  ;;  %v1652_v37 = vpop.f32.mrb[35].mxu0 }
 0x3d4   : > { %1907 = vst.msk [vmem:[%s3558_s12 + $0x10] sm:$0xf] %vm1902_vm8, %v2158_v22  ;;  %v2159_v32 = vpack.c.bf16 %v1827_v10, %v1827_v10  ;;  %v1718_v33 = vadd.f32 %v3545_v57, %v1695_v9  ;;  %v1696_v60 = vmul.f32 %v3540_v41, %v1652_v37 }
 0x3d5   : > { %1910 = vst.msk [vmem:[%s3558_s12 + $0x1c] sm:$0xf] %vm1902_vm8, %v2161_v17  ;;  %v2593_v54 = vadd.low.f32.bf16 %v1720_v26, %v2558_v7  ;;  %v1721_v43 = vadd.f32 %v3545_v57, %v1698_v35 }
 0x3d6   : > { %1908 = vst.msk [vmem:[%s3558_s12 + $0x14] sm:$0xf] %vm1902_vm8, %v2159_v32  ;;  %v2594_v44 = vadd.low.f32.bf16 %v1718_v33, %v2553_v61  ;;  %v1719_v4 = vadd.f32 %v3545_v57, %v1696_v60 }
 0x3d7   : > { %v1832_v49 = vmax.f32 %v2593_v54, 0.0  ;;  %v2595_v18 = vadd.high.f32.bf16 %v1721_v43, %v2558_v7 }
 0x3d8   : > { %v1830_v36 = vmax.f32 %v2594_v44, 0.0  ;;  %v2596_v40 = vadd.high.f32.bf16 %v1719_v4, %v2553_v61  ;;  %v2309_v52 = vpop.f32.mrb[36].mxu0 }
 0x3d9   : > { %v2164_v1 = vpack.c.bf16 %v1832_v49, %v1832_v49  ;;  %v1833_v48 = vmax.f32 %v2595_v18, 0.0  ;;  %v1701_v21 = vmul.f32 %v2309_v52, %v3540_v41  ;;  %v1665_v50 = vpop.f32.mrb[37].mxu0 }
 0x3da   : > { %v2162_v51 = vpack.c.bf16 %v1830_v36, %v1830_v36  ;;  %v1831_v3 = vmax.f32 %v2596_v40, 0.0  ;;  %v1699_v8 = vmul.f32 %v3540_v41, %v1665_v50  ;;  %v2310_v15 = vpop.f32.mrb[38].mxu0 }
 0x3db   : > { %1913 = vst.msk [vmem:[%s3558_s12 + $0x28] sm:$0xf] %vm1902_vm8, %v2164_v1  ;;  %v2165_v16 = vpack.c.bf16 %v1833_v48, %v1833_v48  ;;  %v1724_v23 = vadd.f32 %v3545_v57, %v1701_v21  ;;  %v1702_v30 = vmul.f32 %v2310_v15, %v3540_v41  ;;  %v1668_v28 = vpop.f32.mrb[39].mxu0 }
 0x3dc   : > { %1911 = vst.msk [vmem:[%s3558_s12 + $0x20] sm:$0xf] %vm1902_vm8, %v2162_v51  ;;  %v2163_v19 = vpack.c.bf16 %v1831_v3, %v1831_v3  ;;  %v1722_v42 = vadd.f32 %v3545_v57, %v1699_v8  ;;  %v1700_v5 = vmul.f32 %v3540_v41, %v1668_v28 }
 0x3dd   : > { %1914 = vst.msk [vmem:[%s3558_s12 + $0x2c] sm:$0xf] %vm1902_vm8, %v2165_v16  ;;  %v2597_v27 = vadd.low.f32.bf16 %v1724_v23, %v2568_v24  ;;  %v1725_v63 = vadd.f32 %v3545_v57, %v1702_v30 }
 0x3de   : > { %1912 = vst.msk [vmem:[%s3558_s12 + $0x24] sm:$0xf] %vm1902_vm8, %v2163_v19  ;;  %v2598_v6 = vadd.low.f32.bf16 %v1722_v42, %v2563_v55  ;;  %v1723_v47 = vadd.f32 %v3545_v57, %v1700_v5 }
 0x3df   : > { %v1836_v58 = vmax.f32 %v2597_v27, 0.0  ;;  %v2599_v62 = vadd.high.f32.bf16 %v1725_v63, %v2568_v24 }
 0x3e0   : > { %v1834_v53 = vmax.f32 %v2598_v6, 0.0  ;;  %v2600_v38 = vadd.high.f32.bf16 %v1723_v47, %v2563_v55 }
 0x3e1   : > { %v2168_v29 = vpack.c.bf16 %v1836_v58, %v1836_v58  ;;  %v1837_v34 = vmax.f32 %v2599_v62, 0.0 }
 0x3e2   : > { %v2166_v41 = vpack.c.bf16 %v1834_v53, %v1834_v53  ;;  %v1835_v59 = vmax.f32 %v2600_v38, 0.0 }
 0x3e3   : > { %1917 = vst.msk [vmem:[%s3558_s12 + $0x38] sm:$0xf] %vm1902_vm8, %v2168_v29  ;;  %v2169_v39 = vpack.c.bf16 %v1837_v34, %v1837_v34 }
 0x3e4   : > { %1915 = vst.msk [vmem:[%s3558_s12 + $0x30] sm:$0xf] %vm1902_vm8, %v2166_v41  ;;  %v2167_v11 = vpack.c.bf16 %v1835_v59, %v1835_v59 }
 0x3e5   : > { %1918 = vst.msk [vmem:[%s3558_s12 + $0x3c] sm:$0xf] %vm1902_vm8, %v2169_v39 }
 0x3e6   : > { %1916 = vst.msk [vmem:[%s3558_s12 + $0x34] sm:$0xf] %vm1902_vm8, %v2167_v11 }
 0x3e7 PF: > { %s27_s24 = sadd.s32 1, %s2731_s24   ;;  %s3681_s7 = sld [smem:[#allocation8_spill]] }
 0x3e8   : > { %p24_p3 = scmp.ge.s32.totalorder %s27_s24, 6   ;;  %s3682_s19 = sld [smem:[#allocation12_spill]] }
 0x3e9   : > { %s3683_s27 = sld [smem:[#allocation10_spill]]  ;;  %s3684_s14 = sld [smem:[#allocation11_spill]] }
 0x3ea   : > { %s3685_s17 = smov %s2707_s18  ;;  %s3687_s20 = smov %s2723_s22 }
 0x3eb   : > { %s3688_s21 = smov %s2727_s23  ;;  %26 = sbr.rel (!%p24_p3) target bundleno = 13 (0xd), region = 119 }
 0x3ed   : > { %s3686_s18 = smov %s3681_s7 }
 0x3ef   : > { %s3689_s22 = smov %s3683_s27  ;;  %s3690_s23 = smov %s3684_s14 }
 0x3f2   :  { %1951 = vsyncpa [#allocation3], 1 }
 0x3f3   :  { %1953 = vsyncpa [#allocation3 + $0x1], 1 }
 0x3f4   :  { %1954 = vsyncpa [#allocation5], 1 }
 0x3f5   :  { %1956 = vsyncpa [#allocation5 + $0x1], 1 }

</bundles_post_ra>
